<compile_context>
chip_gen: v7x
topology: tpu7x:2x2x1
jax: 0.10.0
libtpu: 0.0.40
codegen_flags: <defaults>
</compile_context>

<pallas_src>
import functools
import numpy as np

import jax
import jax.numpy as jnp
from jax import lax
from jax.experimental import pallas as pl
from jax.experimental.pallas import tpu as pltpu


def _round_up(x, m):
    return ((x + m - 1) // m) * m


def choose_class_group(mem_pad, n_classes, target_n=512):
    """How many memory-bank classes to fuse into one reduction step."""
    k = max(1, min(target_n // mem_pad, n_classes))
    return k, _round_up(n_classes, k)


def prepare_queue_device(queue_f32, mem_pad, d_pad, n_classes_pad):
    """(C, M, D) f32 queue -> (d_pad, n_classes_pad*mem_pad) bf16, lane-dense in N."""
    C, M, D = queue_f32.shape
    q = np.zeros((d_pad, n_classes_pad * mem_pad), np.float32)
    for c in range(C):
        q[:D, c * mem_pad:c * mem_pad + M] = np.asarray(queue_f32[c], np.float32).T
    return jnp.asarray(q, dtype=jnp.bfloat16)


# ----------------------------------------------------------------------------
# Pallas kernel: _contrastive (memory / pixel_queue path)
# ----------------------------------------------------------------------------
def _contrastive_kernel(a_ref, c_ref, ya_ref, out_ref,
                        m_scr, neg_scr, pos_scr, *,
                        tile_a, k, mem_size, mem_pad, n_classes, n_steps,
                        inv_temp, temp_over_base):
    i = pl.program_id(0)          # anchor-row tile     (parallel)
    n = pl.program_id(1)          # fused class group   (reduction, arbitrary)

    need_mem_mask = mem_size != mem_pad           # trace-time gates
    need_cls_mask = (n_steps * k) != n_classes
    neg_inf = -jnp.inf

    @pl.when(n == 0)
    def _():
        m_scr[...] = jnp.full((tile_a, 1), -jnp.inf, jnp.float32)
        neg_scr[...] = jnp.zeros((tile_a, 1), jnp.float32)
        pos_scr[...] = jnp.zeros((tile_a, mem_pad), jnp.float32)

    # (tile_a, k*mem_pad) logits: bf16 MXU operands, f32 accumulation, then the
    # 1/temperature scale applied in f32 (keeps bf16 rounding on raw features).
    raw = jnp.dot(a_ref[...], c_ref[...],
                  preferred_element_type=jnp.float32) * inv_temp

    ya = ya_ref[...]                              # (tile_a, 1) int32 labels (-1 = pad row)

    if need_mem_mask:                             # hoisted once per step
        mem_col = lax.broadcasted_iota(jnp.int32, (tile_a, mem_pad), 1)
        mem_valid = mem_col < mem_size

    m_cur = m_scr[...]
    neg_cur = neg_scr[...]
    pos_cur = pos_scr[...]

    for sub in range(k):                          # static unroll over class sub-blocks
        blk = raw[:, sub * mem_pad:(sub + 1) * mem_pad]      # 128-aligned static slice
        cls = n * k + sub                                    # dynamic scalar class id
        blk_v = blk
        if need_mem_mask:
            blk_v = jnp.where(mem_valid, blk_v, neg_inf)
        if need_cls_mask:
            blk_v = blk_v + jnp.where(cls < n_classes, 0.0, neg_inf)
        is_pos = ya == cls                                   # (tile_a, 1)

        m_new = jnp.maximum(m_cur, jnp.max(blk_v, axis=1, keepdims=True))
        # guard: m_cur == m_new == -inf would otherwise give exp(nan)
        alpha = jnp.where(m_cur == m_new, 1.0, jnp.exp(m_cur - m_new))
        e = jnp.exp(blk_v - m_new)                           # masked cols -> exp(-inf)=0
        s = jnp.sum(e, axis=1, keepdims=True)
        neg_cur = neg_cur * alpha + jnp.where(is_pos, 0.0, s)
        pos_cur = pos_cur + jnp.where(is_pos, blk, 0.0)      # raw logits of the positive class
        m_cur = m_new

    m_scr[...] = m_cur
    neg_scr[...] = neg_cur
    pos_scr[...] = pos_cur

    @pl.when(n == n_steps - 1)
    def _():
        colp = lax.broadcasted_iota(jnp.int32, (tile_a, mem_pad), 1)
        row = i * tile_a + lax.broadcasted_iota(jnp.int32, (tile_a, 1), 0)
        in_cls = (ya >= 0) & (ya < n_classes)     # padded rows (label -1) drop out
        # PyTorch scatters zeros on the (j, j) diagonal of the un-padded (A, N) mask
        diag = (ya * mem_size + colp) == row
        pos_mask = in_cls & jnp.logical_not(diag)
        if need_mem_mask:
            pos_mask = pos_mask & (colp < mem_size)
        z = pos_cur - m_cur
        log_prob = z - jnp.log(jnp.exp(z) + neg_cur)
        numer = jnp.sum(jnp.where(pos_mask, log_prob, 0.0), axis=1, keepdims=True)
        cnt = jnp.sum(pos_mask.astype(jnp.float32), axis=1, keepdims=True)
        out_ref[...] = (-temp_over_base) * numer / (cnt + 1e-5)


def contrastive_loss_pallas(anchor, y_anchor, queue_dev, *, mem_size, mem_pad,
                            n_classes, k, temperature, base_temperature):
    """anchor: (A, D) f32, y_anchor: (A,) int, queue_dev: (d_pad, C_pad*mem_pad) bf16."""
    anchor = np.asarray(anchor, np.float32)
    A, D = anchor.shape
    d_pad, n_total = queue_dev.shape
    assert d_pad % 128 == 0 and D <= d_pad
    assert n_total % mem_pad == 0
    n_classes_pad = n_total // mem_pad
    assert n_classes_pad % k == 0
    n_steps = n_classes_pad // k
    n_tile = k * mem_pad

    # Anchor-row tiling: big tiles to amortize per-step overhead, but
    #   * keep >=2 parallel tiles for v7x megacore sharding when A is large,
    #   * cap tile_a so the (tile_a, n_tile) f32 temporaries stay ~<= 8 MiB.
    A8 = _round_up(max(A, 8), 8)
    tile_cap = max(8, ((8 << 20) // (16 * n_tile)) // 8 * 8)
    tile_a = min(512, A8, tile_cap)
    if tile_a == A8 and A8 > 256:
        tile_a = _round_up((A8 + 1) // 2, 8)
    A_pad = _round_up(A8, tile_a)

    # host prep: only the (small) anchor tensor and labels are uploaded per call
    a = np.zeros((A_pad, d_pad), np.float32)
    a[:A, :D] = anchor
    ya = np.full((A_pad, 1), -1, np.int32)
    ya[:A, 0] = np.asarray(y_anchor, np.int64)
    a_bf16 = jnp.asarray(a, dtype=jnp.bfloat16)
    ya_dev = jnp.asarray(ya)

    # VMEM: exact double-buffered tiles + scratch + temporaries headroom,
    # clamped well under v7x's 64 MiB physical VMEM (no 32 MiB floor).
    vmem_need = (2 * tile_a * d_pad * 2            # anchors (bf16, 2 buffers)
                 + 2 * d_pad * n_tile * 2          # contrast block (bf16, 2 buffers)
                 + 4 * tile_a * 128 * 4            # ya + out tiles (lane padded)
                 + tile_a * (mem_pad + 2 * 128) * 4  # pos / m / neg scratch
                 + 4 * tile_a * n_tile * 4)        # kernel temporaries headroom
    vmem_limit = int(min(48 << 20, vmem_need + vmem_need // 4 + (2 << 20)))

    kernel = functools.partial(
        _contrastive_kernel, tile_a=tile_a, k=k, mem_size=mem_size,
        mem_pad=mem_pad, n_classes=n_classes, n_steps=n_steps,
        inv_temp=float(1.0 / temperature),
        temp_over_base=float(temperature / base_temperature))

    loss_rows = pl.pallas_call(
        kernel,
        out_shape=jax.ShapeDtypeStruct((A_pad, 1), jnp.float32),
        grid_spec=pltpu.PrefetchScalarGridSpec(
            num_scalar_prefetch=0,
            grid=(A_pad // tile_a, n_steps),
            in_specs=[
                pl.BlockSpec((tile_a, d_pad), lambda i, n: (i, 0)),
                pl.BlockSpec((d_pad, n_tile), lambda i, n: (0, n)),
                pl.BlockSpec((tile_a, 1), lambda i, n: (i, 0)),
            ],
            out_specs=pl.BlockSpec((tile_a, 1), lambda i, n: (i, 0)),
            scratch_shapes=[pltpu.VMEM((tile_a, 1), jnp.float32),
                            pltpu.VMEM((tile_a, 1), jnp.float32),
                            pltpu.VMEM((tile_a, mem_pad), jnp.float32)]),
        compiler_params=pltpu.CompilerParams(
            dimension_semantics=("parallel", "arbitrary"),
            vmem_limit_bytes=vmem_limit),
    )(a_bf16, queue_dev, ya_dev)
    # TODO(synk): for memory_size so large that one class block exceeds VMEM,
    # sub-tile along N (the two-pass variant would also drop pos_scr entirely).

    return jnp.mean(loss_rows[:A, 0])


# ----------------------------------------------------------------------------
# Host-side glue (numpy) mirroring the PyTorch module
# ----------------------------------------------------------------------------
def nearest_resize(x, H, W):
    # PyTorch F.interpolate(..., mode='nearest'): idx = floor(out_i * in / out)
    B, C, H0, W0 = x.shape
    ri = (np.arange(H) * H0) // H
    ci = (np.arange(W) * W0) // W
    return x[:, :, ri[:, None], ci[None, :]]


class PixelContrastLossPallas:
    def __init__(self, temperature=0.07, base_temperature=0.07, max_samples=1024,
                 max_views=100, ignore_index=-100, memory=True, memory_size=100,
                 pixel_update_freq=10, pixel_classes=2, dim=256, seed=0):
        self.temperature = temperature
        self.base_temperature = base_temperature
        self.ignore_label = ignore_index
        self.max_samples = max_samples
        self.max_views = max_views
        self.memory = memory
        self.memory_size = memory_size
        self.pixel_update_freq = pixel_update_freq
        self.pixel_classes = pixel_classes
        self.dim = dim
        self.rng = np.random.default_rng(seed)
        if self.memory:
            sq = self.rng.standard_normal((pixel_classes, memory_size, dim)).astype(np.float32)
            sq = sq / np.maximum(np.linalg.norm(sq, axis=2, keepdims=True), 1e-12)
            self.segment_queue = sq
            self.segment_queue_ptr = np.zeros(pixel_classes, dtype=np.int64)
            # torch: zeros then F.normalize -> stays zeros (norm clamped by eps)
            self.pixel_queue = np.zeros((pixel_classes, memory_size, dim), dtype=np.float32)
            self.pixel_queue_ptr = np.zeros(pixel_classes, dtype=np.int64)
            # kernel-side layout: padded, transposed, bf16, resident on device;
            # updated incrementally instead of re-uploading the full bank each call.
            self.d_pad = _round_up(max(dim, 128), 128)
            self.mem_pad = _round_up(max(memory_size, 128), 128)
            self.k_classes, self.n_classes_pad = choose_class_group(self.mem_pad, pixel_classes)
            self._queue_dev = prepare_queue_device(self.pixel_queue, self.mem_pad,
                                                   self.d_pad, self.n_classes_pad)

    # ---- data-dependent anchor sampling (host side) ----
    # TODO(synk): unique/nonzero/randperm with dynamic shapes stays as numpy glue.
    def _anchor_sampling(self, X, y_hat, y):
        batch_size, _, feat_dim = X.shape
        classes, total_classes = [], 0
        for ii in range(batch_size):
            this_y = y_hat[ii]
            uniq = np.unique(this_y)
            this_classes = [x for x in uniq if x != self.ignore_label]
            this_classes = [x for x in this_classes if (this_y == x).sum() > self.max_views]
            classes.append(this_classes)
            total_classes += len(this_classes)
        if total_classes == 0:
            return None, None
        n_view = self.max_samples // total_classes
        n_view = min(n_view, self.max_views)
        X_ = np.zeros((total_classes, n_view, feat_dim), dtype=np.float32)
        y_ = np.zeros((total_classes,), dtype=np.float32)
        ptr = 0
        for ii in range(batch_size):
            this_y_hat, this_y = y_hat[ii], y[ii]
            for cls_id in classes[ii]:
                hard = np.nonzero((this_y_hat == cls_id) & (this_y != cls_id))[0]
                easy = np.nonzero((this_y_hat == cls_id) & (this_y == cls_id))[0]
                nh, ne = len(hard), len(easy)
                if nh >= n_view / 2 and ne >= n_view / 2:
                    nhk = n_view // 2
                    nek = n_view - nhk
                elif nh >= n_view / 2:
                    nek = ne
                    nhk = n_view - nek
                elif ne >= n_view / 2:
                    nhk = nh
                    nek = n_view - nhk
                else:
                    raise Exception('this should never be touched! {} {} {}'.format(nh, ne, n_view))
                hard = hard[self.rng.permutation(nh)[:nhk]]
                easy = easy[self.rng.permutation(ne)[:nek]]
                idx = np.concatenate([hard, easy])
                X_[ptr] = X[ii, idx, :]
                y_[ptr] = cls_id
                ptr += 1
        return X_, y_

    # TODO(synk): memory-bank enqueue (unique/nonzero/randperm, ptr state) is host numpy.
    # Returns the pixel_queue slab updates so the device-resident copy can be patched.
    def _dequeue_and_enqueue(self, keys, labels):
        keys = np.asarray(keys, np.float32)
        labels = np.asarray(labels, np.float32)
        B, C, H, W = keys.shape
        labels_r = nearest_resize(labels, H, W)
        updates = []
        for bs in range(B):
            this_feat = keys[bs].reshape(C, -1)
            this_label = labels_r[bs].reshape(-1)
            for lb in np.unique(this_label):
                if lb < 0:
                    continue
                idxs = np.nonzero(this_label == lb)[0]
                lb = int(lb)
                feat = this_feat[:, idxs].mean(axis=1)
                ptr = int(self.segment_queue_ptr[lb])
                self.segment_queue[lb, ptr, :] = feat / max(np.linalg.norm(feat), 1e-12)
                self.segment_queue_ptr[lb] = (ptr + 1) % self.memory_size
                num_pixel = idxs.shape[0]
                perm = self.rng.permutation(num_pixel)
                K = min(num_pixel, self.pixel_update_freq)
                feat = this_feat[:, perm[:K]].T
                featn = feat / np.maximum(np.linalg.norm(feat, axis=1, keepdims=True), 1e-12)
                featn = featn.astype(np.float32)
                ptr = int(self.pixel_queue_ptr[lb])
                if ptr + K >= self.memory_size:
                    start = self.memory_size - K
                    self.pixel_queue[lb, -K:, :] = featn
                    self.pixel_queue_ptr[lb] = 0
                else:
                    start = ptr
                    self.pixel_queue[lb, ptr:ptr + K, :] = featn
                    self.pixel_queue_ptr[lb] = (ptr + 1) % self.memory_size
                updates.append((lb, start, featn))
        return updates

    def forward(self, feats, labels, predict):
        # TODO(synk): the memory=False (anchors-as-contrast) branch is not implemented.
        assert self.memory, "only the memory (pixel_queue) path is implemented"
        feats_np = np.asarray(feats, dtype=np.float32)
        labels_np = np.asarray(labels, dtype=np.float32)
        predict_np = np.asarray(predict, dtype=np.float32)
        queue_feats = feats_np.copy()
        origin_labels = labels_np.copy()

        B, Cc, H, W = feats_np.shape
        assert Cc == self.dim
        labels_r = nearest_resize(labels_np, H, W).astype(np.int64)
        predict_r = nearest_resize(predict_np, H, W)
        labels_flat = labels_r.reshape(B, -1)
        predict_flat = predict_r.reshape(B, -1)
        feats_perm = np.transpose(feats_np, (0, 2, 3, 1)).reshape(B, -1, Cc)

        X_, y_ = self._anchor_sampling(feats_perm, labels_flat, predict_flat)
        assert X_ is not None, "no valid anchor classes sampled"
        total_classes, n_view, D = X_.shape

        # anchor_feature = torch.cat(torch.unbind(X_, dim=1), dim=0) -> view-major rows
        anchor_feature = np.transpose(X_, (1, 0, 2)).reshape(total_classes * n_view, D)
        y_anchor = np.tile(y_, n_view).astype(np.int32)

        queue_snapshot = self.pixel_queue.copy()     # pre-update bank (verification aux)
        loss = contrastive_loss_pallas(
            anchor_feature, y_anchor, self._queue_dev,
            mem_size=self.memory_size, mem_pad=self.mem_pad,
            n_classes=self.pixel_classes, k=self.k_classes,
            temperature=self.temperature, base_temperature=self.base_temperature)

        # memory-bank side effect (does not change the returned loss); mirror only
        # the touched pixel-queue slabs into the resident device copy.
        for lb, start, featn in self._dequeue_and_enqueue(queue_feats, origin_labels):
            K = featn.shape[0]
            col0 = lb * self.mem_pad + start
            blk = jnp.asarray(featn.T, dtype=jnp.bfloat16)            # (D, K)
            self._queue_dev = self._queue_dev.at[0:self.dim, col0:col0 + K].set(blk)

        aux = {"anchor": anchor_feature, "y_anchor": y_anchor, "queue": queue_snapshot}
        return loss, aux


# ----------------------------------------------------------------------------
# numpy reference of _contrastive (memory path) for verification only.
# Uses the same bf16-rounded matmul operands the kernel consumes.
# ----------------------------------------------------------------------------
def contrastive_ref(anchor, y_anchor, queue, temperature, base_temperature):
    a = np.asarray(jnp.asarray(np.asarray(anchor, np.float32), jnp.bfloat16), np.float32)
    q = np.asarray(jnp.asarray(np.asarray(queue, np.float32), jnp.bfloat16), np.float32)
    Ccls, M, D = q.shape
    contrast = q.reshape(Ccls * M, D)
    yc = np.repeat(np.arange(Ccls), M)
    logits_raw = (a @ contrast.T) * np.float32(1.0 / temperature)
    logits = logits_raw - logits_raw.max(axis=1, keepdims=True)
    mask = (np.asarray(y_anchor)[:, None] == yc[None, :]).astype(np.float32)
    neg_mask = 1.0 - mask
    A, N = mask.shape
    kk = min(A, N)
    lm = np.ones_like(mask)
    lm[np.arange(kk), np.arange(kk)] = 0.0
    mask = mask * lm
    exp_l = np.exp(logits)
    neg_l = (exp_l * neg_mask).sum(1, keepdims=True)
    log_prob = logits - np.log(exp_l + neg_l)
    mlp = (mask * log_prob).sum(1) / (mask.sum(1) + 1e-5)
    return float((-(temperature / base_temperature) * mlp).mean())


if __name__ == "__main__":
    # Small, module-consistent shapes: dim (=C) 32, memory_size 64, 2 classes.
    B, Cdim, H, W = 2, 32, 16, 16
    mod = PixelContrastLossPallas(
        temperature=0.07, base_temperature=0.07, max_samples=128, max_views=16,
        ignore_index=-100, memory=True, memory_size=64, pixel_update_freq=10,
        pixel_classes=2, dim=Cdim, seed=0)

    key = jax.random.PRNGKey(0)
    k1, k2, k3 = jax.random.split(key, 3)
    feats = jax.random.normal(k1, (B, Cdim, H, W), dtype=jnp.float32)
    labels = jax.random.randint(k2, (B, 1, H, W), 0, 2).astype(jnp.float32)
    predict = jax.random.randint(k3, (B, 1, H, W), 0, 2).astype(jnp.float32)

    # First call: queue is all zeros.  Second call: queue has been populated by
    # the first call's enqueue (via incremental device-side updates), so the
    # kernel is exercised on non-trivial data and the mirrored bank is checked.
    for step in range(2):
        loss, aux = mod.forward(feats, labels, predict)
        loss = jax.block_until_ready(loss)
        ref = contrastive_ref(aux["anchor"], aux["y_anchor"], aux["queue"],
                              mod.temperature, mod.base_temperature)
        assert np.isfinite(float(loss)), float(loss)
        assert np.allclose(float(loss), ref, rtol=2e-3, atol=2e-3), (step, float(loss), ref)

    print("KERNEL_OK")
</pallas_src>

<mosaic_0001>
module attributes {stable_mosaic.version = 11 : i64} {
  func.func @_contrastive_kernel(%arg0: i32, %arg1: i32, %arg2: memref<64x128xbf16, #tpu.memory_space<vmem>>, %arg3: memref<128x256xbf16, #tpu.memory_space<vmem>>, %arg4: memref<64x1xi32, #tpu.memory_space<vmem>>, %arg5: memref<64x1xf32, #tpu.memory_space<vmem>>, %arg6: memref<64x1xf32, #tpu.memory_space<vmem>>, %arg7: memref<64x1xf32, #tpu.memory_space<vmem>>, %arg8: memref<64x128xf32, #tpu.memory_space<vmem>>) attributes {dimension_semantics = [#tpu.dimension_semantics<parallel>, #tpu.dimension_semantics<arbitrary>], iteration_bounds = array<i64: 1, 1>, scalar_prefetch = 0 : i64, scratch_operands = 3 : i64, tpu.core_type = #tpu.core_type<tc>, window_params = [{transform_indices = @transform_0, window_bounds = array<i64: 64, 128>}, {transform_indices = @transform_1, window_bounds = array<i64: 128, 256>}, {transform_indices = @transform_2, window_bounds = array<i64: 64, 1>}, {transform_indices = @transform_3, window_bounds = array<i64: 64, 1>}]} {
    %c0_i32 = arith.constant 0 : i32
    %0 = arith.cmpi eq, %arg1, %c0_i32 : i32
    %1 = arith.extui %0 : i1 to i32
    %c0_i32_0 = arith.constant 0 : i32
    %2 = arith.cmpi ne, %1, %c0_i32_0 : i32
    scf.if %2 {
      %cst_35 = arith.constant 0xFF800000 : f32
      %79 = vector.broadcast %cst_35 : f32 to vector<64x1xf32>
      %c0_36 = arith.constant 0 : index
      %c0_37 = arith.constant 0 : index
      %80 = vector.load %arg6[%c0_36, %c0_37] : memref<64x1xf32, #tpu.memory_space<vmem>>, vector<64x1xf32>
      tpu.vector_store %arg6[%c0_36, %c0_37], %79 {strides = array<i32>} : memref<64x1xf32, #tpu.memory_space<vmem>>, vector<64x1xf32>,
      %cst_38 = arith.constant 0.000000e+00 : f32
      %81 = vector.broadcast %cst_38 : f32 to vector<64x1xf32>
      %c0_39 = arith.constant 0 : index
      %c0_40 = arith.constant 0 : index
      %82 = vector.load %arg7[%c0_39, %c0_40] : memref<64x1xf32, #tpu.memory_space<vmem>>, vector<64x1xf32>
      tpu.vector_store %arg7[%c0_39, %c0_40], %81 {strides = array<i32>} : memref<64x1xf32, #tpu.memory_space<vmem>>, vector<64x1xf32>,
      %cst_41 = arith.constant 0.000000e+00 : f32
      %83 = vector.broadcast %cst_41 : f32 to vector<64x128xf32>
      %c0_42 = arith.constant 0 : index
      %c0_43 = arith.constant 0 : index
      %84 = vector.load %arg8[%c0_42, %c0_43] : memref<64x128xf32, #tpu.memory_space<vmem>>, vector<64x128xf32>
      tpu.vector_store %arg8[%c0_42, %c0_43], %83 {strides = array<i32>} : memref<64x128xf32, #tpu.memory_space<vmem>>, vector<64x128xf32>,
    } else {
    }
    %c0 = arith.constant 0 : index
    %c0_1 = arith.constant 0 : index
    %3 = vector.load %arg2[%c0, %c0_1] : memref<64x128xbf16, #tpu.memory_space<vmem>>, vector<64x128xbf16>
    %c0_2 = arith.constant 0 : index
    %c0_3 = arith.constant 0 : index
    %4 = vector.load %arg3[%c0_2, %c0_3] : memref<128x256xbf16, #tpu.memory_space<vmem>>, vector<128x256xbf16>
    %cst = arith.constant dense<0.000000e+00> : vector<64x256xf32>
    %5 = tpu.matmul %3, %4, %cst {dimension_numbers = #tpu.dot_dimension_numbers<[1], [0], [0], [1], [0, 0, 1, 1], [], []>} : vector<64x128xbf16>, vector<128x256xbf16>, vector<64x256xf32> -> vector<64x256xf32>
    %cst_4 = arith.constant 14.2857141 : f32
    %6 = vector.broadcast %cst_4 : f32 to vector<64x256xf32>
    %7 = arith.mulf %5, %6 : vector<64x256xf32>
    %c0_5 = arith.constant 0 : index
    %c0_6 = arith.constant 0 : index
    %8 = vector.load %arg4[%c0_5, %c0_6] : memref<64x1xi32, #tpu.memory_space<vmem>>, vector<64x1xi32>
    %9 = tpu.iota {dimensions = array<i32: 1>} : vector<64x128xi32>
    %c64_i32 = arith.constant 64 : i32
    %10 = vector.broadcast %c64_i32 : i32 to vector<64x128xi32>
    %11 = arith.cmpi slt, %9, %10 : vector<64x128xi32>
    %c0_7 = arith.constant 0 : index
    %c0_8 = arith.constant 0 : index
    %12 = vector.load %arg6[%c0_7, %c0_8] : memref<64x1xf32, #tpu.memory_space<vmem>>, vector<64x1xf32>
    %c0_9 = arith.constant 0 : index
    %c0_10 = arith.constant 0 : index
    %13 = vector.load %arg7[%c0_9, %c0_10] : memref<64x1xf32, #tpu.memory_space<vmem>>, vector<64x1xf32>
    %c0_11 = arith.constant 0 : index
    %c0_12 = arith.constant 0 : index
    %14 = vector.load %arg8[%c0_11, %c0_12] : memref<64x128xf32, #tpu.memory_space<vmem>>, vector<64x128xf32>
    %15 = vector.extract_strided_slice %7 {offsets = [0, 0], sizes = [64, 128], strides = [1, 1]} : vector<64x256xf32> to vector<64x128xf32>
    %c2_i32 = arith.constant 2 : i32
    %16 = arith.muli %arg1, %c2_i32 : i32
    %c0_i32_13 = arith.constant 0 : i32
    %17 = arith.addi %16, %c0_i32_13 : i32
    %cst_14 = arith.constant 0xFF800000 : f32
    %18 = vector.broadcast %cst_14 : f32 to vector<64x128xf32>
    %19 = arith.select %11, %15, %18 : vector<64x128xi1>, vector<64x128xf32>
    %20 = vector.broadcast %17 : i32 to vector<64x1xi32>
    %21 = arith.cmpi eq, %8, %20 : vector<64x1xi32>
    %cst_15 = arith.constant dense<0xFF800000> : vector<64xf32>
    %22 = vector.multi_reduction <maximumf>, %19, %cst_15 [1] : vector<64x128xf32> to vector<64xf32>
    %23 = vector.shape_cast %22 : vector<64xf32> to vector<64x1xf32>
    %24 = arith.maximumf %12, %23 : vector<64x1xf32>
    %25 = arith.cmpf oeq, %12, %24 : vector<64x1xf32>
    %26 = arith.subf %12, %24 : vector<64x1xf32>
    %27 = math.exp %26 : vector<64x1xf32>
    %cst_16 = arith.constant 1.000000e+00 : f32
    %28 = vector.broadcast %cst_16 : f32 to vector<64x1xf32>
    %29 = arith.select %25, %28, %27 : vector<64x1xi1>, vector<64x1xf32>
    %30 = vector.broadcast %24 : vector<64x1xf32> to vector<64x128xf32>
    %31 = arith.subf %19, %30 : vector<64x128xf32>
    %32 = math.exp %31 : vector<64x128xf32>
    %cst_17 = arith.constant dense<0.000000e+00> : vector<64xf32>
    %33 = vector.multi_reduction <add>, %32, %cst_17 [1] : vector<64x128xf32> to vector<64xf32>
    %34 = vector.shape_cast %33 : vector<64xf32> to vector<64x1xf32>
    %35 = arith.mulf %13, %29 : vector<64x1xf32>
    %cst_18 = arith.constant 0.000000e+00 : f32
    %36 = vector.broadcast %cst_18 : f32 to vector<64x1xf32>
    %37 = arith.select %21, %36, %34 : vector<64x1xi1>, vector<64x1xf32>
    %38 = arith.addf %35, %37 : vector<64x1xf32>
    %cst_19 = arith.constant 0.000000e+00 : f32
    %39 = vector.shape_cast %21 : vector<64x1xi1> to vector<64x1xi1>
    %40 = vector.broadcast %39 : vector<64x1xi1> to vector<64x128xi1>
    %41 = vector.broadcast %cst_19 : f32 to vector<64x128xf32>
    %42 = arith.select %40, %15, %41 : vector<64x128xi1>, vector<64x128xf32>
    %43 = arith.addf %14, %42 : vector<64x128xf32>
    %44 = vector.extract_strided_slice %7 {offsets = [0, 128], sizes = [64, 128], strides = [1, 1]} : vector<64x256xf32> to vector<64x128xf32>
    %c2_i32_20 = arith.constant 2 : i32
    %45 = arith.muli %arg1, %c2_i32_20 : i32
    %c1_i32 = arith.constant 1 : i32
    %46 = arith.addi %45, %c1_i32 : i32
    %cst_21 = arith.constant 0xFF800000 : f32
    %47 = vector.broadcast %cst_21 : f32 to vector<64x128xf32>
    %48 = arith.select %11, %44, %47 : vector<64x128xi1>, vector<64x128xf32>
    %49 = vector.broadcast %46 : i32 to vector<64x1xi32>
    %50 = arith.cmpi eq, %8, %49 : vector<64x1xi32>
    %cst_22 = arith.constant dense<0xFF800000> : vector<64xf32>
    %51 = vector.multi_reduction <maximumf>, %48, %cst_22 [1] : vector<64x128xf32> to vector<64xf32>
    %52 = vector.shape_cast %51 : vector<64xf32> to vector<64x1xf32>
    %53 = arith.maximumf %24, %52 : vector<64x1xf32>
    %54 = arith.cmpf oeq, %24, %53 : vector<64x1xf32>
    %55 = arith.subf %24, %53 : vector<64x1xf32>
    %56 = math.exp %55 : vector<64x1xf32>
    %cst_23 = arith.constant 1.000000e+00 : f32
    %57 = vector.broadcast %cst_23 : f32 to vector<64x1xf32>
    %58 = arith.select %54, %57, %56 : vector<64x1xi1>, vector<64x1xf32>
    %59 = vector.broadcast %53 : vector<64x1xf32> to vector<64x128xf32>
    %60 = arith.subf %48, %59 : vector<64x128xf32>
    %61 = math.exp %60 : vector<64x128xf32>
    %cst_24 = arith.constant dense<0.000000e+00> : vector<64xf32>
    %62 = vector.multi_reduction <add>, %61, %cst_24 [1] : vector<64x128xf32> to vector<64xf32>
    %63 = vector.shape_cast %62 : vector<64xf32> to vector<64x1xf32>
    %64 = arith.mulf %38, %58 : vector<64x1xf32>
    %cst_25 = arith.constant 0.000000e+00 : f32
    %65 = vector.broadcast %cst_25 : f32 to vector<64x1xf32>
    %66 = arith.select %50, %65, %63 : vector<64x1xi1>, vector<64x1xf32>
    %67 = arith.addf %64, %66 : vector<64x1xf32>
    %cst_26 = arith.constant 0.000000e+00 : f32
    %68 = vector.shape_cast %50 : vector<64x1xi1> to vector<64x1xi1>
    %69 = vector.broadcast %68 : vector<64x1xi1> to vector<64x128xi1>
    %70 = vector.broadcast %cst_26 : f32 to vector<64x128xf32>
    %71 = arith.select %69, %44, %70 : vector<64x128xi1>, vector<64x128xf32>
    %72 = arith.addf %43, %71 : vector<64x128xf32>
    %c0_27 = arith.constant 0 : index
    %c0_28 = arith.constant 0 : index
    %73 = vector.load %arg6[%c0_27, %c0_28] : memref<64x1xf32, #tpu.memory_space<vmem>>, vector<64x1xf32>
    tpu.vector_store %arg6[%c0_27, %c0_28], %53 {strides = array<i32>} : memref<64x1xf32, #tpu.memory_space<vmem>>, vector<64x1xf32>,
    %c0_29 = arith.constant 0 : index
    %c0_30 = arith.constant 0 : index
    %74 = vector.load %arg7[%c0_29, %c0_30] : memref<64x1xf32, #tpu.memory_space<vmem>>, vector<64x1xf32>
    tpu.vector_store %arg7[%c0_29, %c0_30], %67 {strides = array<i32>} : memref<64x1xf32, #tpu.memory_space<vmem>>, vector<64x1xf32>,
    %c0_31 = arith.constant 0 : index
    %c0_32 = arith.constant 0 : index
    %75 = vector.load %arg8[%c0_31, %c0_32] : memref<64x128xf32, #tpu.memory_space<vmem>>, vector<64x128xf32>
    tpu.vector_store %arg8[%c0_31, %c0_32], %72 {strides = array<i32>} : memref<64x128xf32, #tpu.memory_space<vmem>>, vector<64x128xf32>,
    %c0_i32_33 = arith.constant 0 : i32
    %76 = arith.cmpi eq, %arg1, %c0_i32_33 : i32
    %77 = arith.extui %76 : i1 to i32
    %c0_i32_34 = arith.constant 0 : i32
    %78 = arith.cmpi ne, %77, %c0_i32_34 : i32
    scf.if %78 {
      %79 = tpu.iota {dimensions = array<i32: 1>} : vector<64x128xi32>
      %c64_i32_35 = arith.constant 64 : i32
      %80 = arith.muli %arg0, %c64_i32_35 : i32
      %81 = tpu.iota {dimensions = array<i32: 0>} : vector<64x1xi32>
      %82 = vector.broadcast %80 : i32 to vector<64x1xi32>
      %83 = arith.addi %82, %81 : vector<64x1xi32>
      %c0_i32_36 = arith.constant 0 : i32
      %84 = vector.broadcast %c0_i32_36 : i32 to vector<64x1xi32>
      %85 = arith.cmpi sge, %8, %84 : vector<64x1xi32>
      %c2_i32_37 = arith.constant 2 : i32
      %86 = vector.broadcast %c2_i32_37 : i32 to vector<64x1xi32>
      %87 = arith.cmpi slt, %8, %86 : vector<64x1xi32>
      %88 = arith.andi %85, %87 : vector<64x1xi1>
      %c64_i32_38 = arith.constant 64 : i32
      %89 = vector.broadcast %c64_i32_38 : i32 to vector<64x1xi32>
      %90 = arith.muli %8, %89 : vector<64x1xi32>
      %91 = vector.broadcast %90 : vector<64x1xi32> to vector<64x128xi32>
      %92 = arith.addi %91, %79 : vector<64x128xi32>
      %93 = vector.broadcast %83 : vector<64x1xi32> to vector<64x128xi32>
      %94 = arith.cmpi eq, %92, %93 : vector<64x128xi32>
      %cst_39 = arith.constant dense<true> : vector<64x128xi1>
      %95 = arith.xori %94, %cst_39 : vector<64x128xi1>
      %96 = vector.broadcast %88 : vector<64x1xi1> to vector<64x128xi1>
      %97 = arith.andi %96, %95 : vector<64x128xi1>
      %c64_i32_40 = arith.constant 64 : i32
      %98 = vector.broadcast %c64_i32_40 : i32 to vector<64x128xi32>
      %99 = arith.cmpi slt, %79, %98 : vector<64x128xi32>
      %100 = arith.andi %97, %99 : vector<64x128xi1>
      %101 = vector.broadcast %53 : vector<64x1xf32> to vector<64x128xf32>
      %102 = arith.subf %72, %101 : vector<64x128xf32>
      %103 = math.exp %102 : vector<64x128xf32>
      %104 = vector.broadcast %67 : vector<64x1xf32> to vector<64x128xf32>
      %105 = arith.addf %103, %104 : vector<64x128xf32>
      %106 = math.log %105 : vector<64x128xf32>
      %107 = arith.subf %102, %106 : vector<64x128xf32>
      %cst_41 = arith.constant 0.000000e+00 : f32
      %108 = vector.broadcast %cst_41 : f32 to vector<64x128xf32>
      %109 = arith.select %100, %107, %108 : vector<64x128xi1>, vector<64x128xf32>
      %cst_42 = arith.constant dense<0.000000e+00> : vector<64xf32>
      %110 = vector.multi_reduction <add>, %109, %cst_42 [1] : vector<64x128xf32> to vector<64xf32>
      %111 = vector.shape_cast %110 : vector<64xf32> to vector<64x1xf32>
      %112 = arith.extui %100 : vector<64x128xi1> to vector<64x128xi32>
      %113 = arith.sitofp %112 : vector<64x128xi32> to vector<64x128xf32>
      %cst_43 = arith.constant dense<0.000000e+00> : vector<64xf32>
      %114 = vector.multi_reduction <add>, %113, %cst_43 [1] : vector<64x128xf32> to vector<64xf32>
      %115 = vector.shape_cast %114 : vector<64xf32> to vector<64x1xf32>
      %cst_44 = arith.constant -1.000000e+00 : f32
      %116 = vector.broadcast %cst_44 : f32 to vector<64x1xf32>
      %117 = arith.mulf %116, %111 : vector<64x1xf32>
      %cst_45 = arith.constant 9.99999974E-6 : f32
      %118 = vector.broadcast %cst_45 : f32 to vector<64x1xf32>
      %119 = arith.addf %115, %118 : vector<64x1xf32>
      %120 = arith.divf %117, %119 : vector<64x1xf32>
      %c0_46 = arith.constant 0 : index
      %c0_47 = arith.constant 0 : index
      %121 = vector.load %arg5[%c0_46, %c0_47] : memref<64x1xf32, #tpu.memory_space<vmem>>, vector<64x1xf32>
      tpu.vector_store %arg5[%c0_46, %c0_47], %120 {strides = array<i32>} : memref<64x1xf32, #tpu.memory_space<vmem>>, vector<64x1xf32>,
    } else {
    }
    return
  }
  func.func @transform_0(%arg0: i32, %arg1: i32) -> (i32, i32) {
    %c0_i32 = arith.constant 0 : i32
    %c0_i32_0 = arith.constant 0 : i32
    return %arg0, %c0_i32 : i32, i32
  }
  func.func @transform_1(%arg0: i32, %arg1: i32) -> (i32, i32) {
    %c0_i32 = arith.constant 0 : i32
    %c0_i32_0 = arith.constant 0 : i32
    return %c0_i32, %arg1 : i32, i32
  }
  func.func @transform_2(%arg0: i32, %arg1: i32) -> (i32, i32) {
    %c0_i32 = arith.constant 0 : i32
    %c0_i32_0 = arith.constant 0 : i32
    return %arg0, %c0_i32 : i32, i32
  }
  func.func @transform_3(%arg0: i32, %arg1: i32) -> (i32, i32) {
    %c0_i32 = arith.constant 0 : i32
    %c0_i32_0 = arith.constant 0 : i32
    return %arg0, %c0_i32 : i32, i32
  }
}

</mosaic_0001>

<bundles_post_ra>
// kernel: tpu_custom_call.1
= control target key start
LH: loop header
LB: loop body
LE: loop exit
PB: predicated region body
PF: predicated region fallthrough
CT: control target
= control target key end

     0   :  { %8 = vsyncpa [#allocation6], 0  ;;  %s1391_s12 = smov [#allocation5]   ;;  %s2297_s0 = inlined_call_operand.vmem [shape: bf16[64,128], index: 0, kind: input, shape index: {}]   ;;  %s2298_s1 = inlined_call_operand.hbm [shape: bf16[128,256], index: 1, kind: input, shape index: {}]   ;;  %s2299_s2 = inlined_call_operand.vmem [shape: s32[64,1], index: 2, kind: input, shape index: {}]   ;;  %s2300_s3 = inlined_call_operand.vmem [shape: f32[64,1], index: 3, kind: output, shape index: {}]  }
   0x1   :  { %s16_s13 = sshll.u32 %s1391_s12, 4  ;;  %s1367_s16 = scalar_lea.hbm %s2298_s1, 2048  ;;  %s17_s13 = int_to_ptr.vmem [resolvable:$true] %s16_s13 }
   0x2   :  { %p1368_p0 = scmp.ne.s32.totalorder %s2298_s1, %s1367_s16  ;;  %p1371_p1 = scmp.lt.u32.totalorder %s1367_s16, %s2298_s1 }
   0x4   :  { %p1373_p2 = pnand %p1371_p1, %p1368_p0 }
   0x6   :  { %1376 = shalt.err (!%p1373_p2)
}
   0x7   :  { %s1377_s21 = scalar_lea.vmem %s17_s13, 2048  ;;  %p1382_p4 = scmp.lt.s32.totalorder %s17_s13, %s17_s13 }
   0x8   :  { %p1378_p3 = scmp.ne.s32.totalorder %s17_s13, %s1377_s21  ;;  %p1383_p5 = scmp.lt.s32.totalorder %s1377_s21, %s1377_s21 }
   0xa   :  { %p1384_p6 = por %p1383_p5, %p1382_p4 }
   0xc   :  { %p1385_p7 = pnand %p1384_p6, %p1378_p3 }
   0xe   :  { %1388 = shalt.err (!%p1385_p7)
}
   0xf   :  { %s1392_s22 = smov 128   ;;  %s1393_s23 = smov 8  }
  0x10   :  { %22 = dma.hbm_to_vmem [thread:$0]  %s2298_s1, 2048, %s17_s13, [#allocation6], %s1392_s22, %s1392_s22, %s1393_s23  }
  0x11   :  { %1389 = dma.done.wait [#allocation6], 2048  }
  0x12   :  { %1390 = vsyncadd [#allocation6], 4294965248  ;;  %v2306_v0 = vmov 0   ;;  %v1227_v1 = vld [vmem:[#allocation5 + $0x4] ss:$8 sps:$4 sm:$0xff]   ;;  %v1252_v18 = vld [vmem:[%s2297_s0 + $0x10] sm:$0xff]   ;;  %v2303_v22 = vlaneseq }
  0x13   :  { %218 = vmatprep.mubr.bf16.mxu0 %v2306_v0  ;;  %238 = vmatprep.mubr.bf16.mxu1 %v2306_v0  ;;  %v1229_v2 = vld [vmem:[#allocation5] ss:$8 sps:$4 sm:$0xff]   ;;  %v1230_v3 = vld [vmem:[#allocation5 + $0x14] ss:$8 sps:$4 sm:$0xff]   ;;  %v1232_v4 = vld [vmem:[#allocation5 + $0x10] ss:$8 sps:$4 sm:$0xff]  }
  0x14   :  { %1225 = vset.pattern.permute.xlu0 %v2306_v0  ;;  %1226 = vset.pattern.permute.xlu1 %v2306_v0  ;;  %v1233_v5 = vld [vmem:[#allocation5 + $0x24] ss:$8 sps:$4 sm:$0xff]   ;;  %v1235_v6 = vld [vmem:[#allocation5 + $0x20] ss:$8 sps:$4 sm:$0xff]   ;;  %v1236_v7 = vld [vmem:[#allocation5 + $0x34] ss:$8 sps:$4 sm:$0xff]  }
  0x15   :  { %186 = vmatprep.subr.bf16.mxu0 %v1227_v1  ;;  %1202 = vmatprep.subr.bf16.mxu1 %v1227_v1  ;;  %v1238_v8 = vld [vmem:[#allocation5 + $0x30] ss:$8 sps:$4 sm:$0xff]   ;;  %v1239_v9 = vld [vmem:[#allocation5 + $0x44] ss:$8 sps:$4 sm:$0xff]   ;;  %v1241_v10 = vld [vmem:[#allocation5 + $0x40] ss:$8 sps:$4 sm:$0xff]  }
  0x16   :  { %187 = vmatpush1.bf16.msra.mxu0 %v1229_v2  ;;  %1210 = vmatpush1.bf16.msra.mxu1 %v1229_v2  ;;  %v1242_v11 = vld [vmem:[#allocation5 + $0x54] ss:$8 sps:$4 sm:$0xff]   ;;  %v1244_v12 = vld [vmem:[#allocation5 + $0x50] ss:$8 sps:$4 sm:$0xff]   ;;  %v1245_v13 = vld [vmem:[#allocation5 + $0x64] ss:$8 sps:$4 sm:$0xff]  }
  0x17   :  { %188 = vmatprep.subr.bf16.mxu0 %v1230_v3  ;;  %1203 = vmatprep.subr.bf16.mxu1 %v1230_v3  ;;  %v1247_v14 = vld [vmem:[#allocation5 + $0x60] ss:$8 sps:$4 sm:$0xff]   ;;  %v1248_v15 = vld [vmem:[#allocation5 + $0x74] ss:$8 sps:$4 sm:$0xff]   ;;  %v1250_v16 = vld [vmem:[#allocation5 + $0x70] ss:$8 sps:$4 sm:$0xff]  }
  0x18   :  { %v1251_v17 = vld [vmem:[%s2297_s0] sm:$0xff]   ;;  %v1253_v19 = vld [vmem:[%s2297_s0 + $0x8] sm:$0xff]   ;;  %v1254_v20 = vld [vmem:[%s2297_s0 + $0x18] sm:$0xff]   ;;  %vm2323_vm0 = vcmask 7168   ;;  %v1395_v21 = vmov -inf   ;;  %v1457_v23 = vand.u32 127, %v2303_v22 }
  0x19   :  { %34 = vst.msk [vmem:[#allocation2] sm:$0xff] %vm2323_vm0, %v1395_v21  ;;  %35 = vst.msk [vmem:[#allocation2 + $0x8] sm:$0xff] %vm2323_vm0, %v1395_v21 }
  0x1a   :  { %189 = vmatpush1.bf16.msra.mxu0 %v1232_v4  ;;  %1211 = vmatpush1.bf16.msra.mxu1 %v1232_v4  ;;  %36 = vst.msk [vmem:[#allocation2 + $0x10] sm:$0xff] %vm2323_vm0, %v1395_v21  ;;  %37 = vst.msk [vmem:[#allocation2 + $0x18] sm:$0xff] %vm2323_vm0, %v1395_v21  ;;  %vm2312_vm1 = vcmp.lt.s32.totalorder %v1457_v23, 64 }
  0x1b   :  { %190 = vmatprep.subr.bf16.mxu0 %v1233_v5  ;;  %1204 = vmatprep.subr.bf16.mxu1 %v1233_v5  ;;  %38 = vst.msk [vmem:[#allocation2 + $0x20] sm:$0xff] %vm2323_vm0, %v1395_v21  ;;  %39 = vst.msk [vmem:[#allocation2 + $0x28] sm:$0xff] %vm2323_vm0, %v1395_v21 }
  0x1c   :  { %40 = vst.msk [vmem:[#allocation2 + $0x30] sm:$0xff] %vm2323_vm0, %v1395_v21  ;;  %41 = vst.msk [vmem:[#allocation2 + $0x38] sm:$0xff] %vm2323_vm0, %v1395_v21 }
  0x1d   :  { %2326 = vst [vmem:[#allocation8_spill] sm:$0xff] %v1457_v23 }
  0x1e   :  { %191 = vmatpush1.bf16.msra.mxu0 %v1235_v6  ;;  %1212 = vmatpush1.bf16.msra.mxu1 %v1235_v6 }
  0x1f   :  { %192 = vmatprep.subr.bf16.mxu0 %v1236_v7  ;;  %1205 = vmatprep.subr.bf16.mxu1 %v1236_v7 }
  0x22   :  { %193 = vmatpush1.bf16.msra.mxu0 %v1238_v8  ;;  %1213 = vmatpush1.bf16.msra.mxu1 %v1238_v8 }
  0x23   :  { %194 = vmatprep.subr.bf16.mxu0 %v1239_v9  ;;  %1206 = vmatprep.subr.bf16.mxu1 %v1239_v9  ;;  %v2301_v9 = vmov 0.0  }
  0x24   :  { %42 = vst.msk [vmem:[#allocation3] sm:$0xff] %vm2323_vm0, %v2301_v9  ;;  %43 = vst.msk [vmem:[#allocation3 + $0x8] sm:$0xff] %vm2323_vm0, %v2301_v9 }
  0x25   :  { %44 = vst.msk [vmem:[#allocation3 + $0x10] sm:$0xff] %vm2323_vm0, %v2301_v9  ;;  %45 = vst.msk [vmem:[#allocation3 + $0x18] sm:$0xff] %vm2323_vm0, %v2301_v9 }
  0x26   :  { %195 = vmatpush1.bf16.msra.mxu0 %v1241_v10  ;;  %1214 = vmatpush1.bf16.msra.mxu1 %v1241_v10  ;;  %46 = vst.msk [vmem:[#allocation3 + $0x20] sm:$0xff] %vm2323_vm0, %v2301_v9  ;;  %47 = vst.msk [vmem:[#allocation3 + $0x28] sm:$0xff] %vm2323_vm0, %v2301_v9  ;;  %v1604_v10 = vld [vmem:[#allocation2] sm:$0xff] }
  0x27   :  { %196 = vmatprep.subr.bf16.mxu0 %v1242_v11  ;;  %1207 = vmatprep.subr.bf16.mxu1 %v1242_v11  ;;  %48 = vst.msk [vmem:[#allocation3 + $0x30] sm:$0xff] %vm2323_vm0, %v2301_v9  ;;  %49 = vst.msk [vmem:[#allocation3 + $0x38] sm:$0xff] %vm2323_vm0, %v2301_v9 }
  0x2a   :  { %197 = vmatpush1.bf16.msra.mxu0 %v1244_v12  ;;  %1215 = vmatpush1.bf16.msra.mxu1 %v1244_v12 }
  0x2b   :  { %198 = vmatprep.subr.bf16.mxu0 %v1245_v13  ;;  %1208 = vmatprep.subr.bf16.mxu1 %v1245_v13 }
  0x2e   :  { %199 = vmatpush1.bf16.msra.mxu0 %v1247_v14  ;;  %1216 = vmatpush1.bf16.msra.mxu1 %v1247_v14  ;;  %v1609_v14 = vld [vmem:[#allocation2 + $0x20] sm:$0xff] }
  0x2f   :  { %200 = vmatprep.subr.bf16.mxu0 %v1248_v15  ;;  %1209 = vmatprep.subr.bf16.mxu1 %v1248_v15 }
  0x32   :  { %201 = vmatpush1.bf16.msra.mxu0 %v1250_v16  ;;  %1217 = vmatpush1.bf16.msra.mxu1 %v1250_v16 }
  0x35   :  { %219 = vmatmul.mubr.bf16.vlgmr.msra.gmra.mrb[0].mxu0 %v1251_v17  ;;  %239 = vmatmul.mubr.bf16.vlgmr.msra.gmra.mrb[0].mxu1 %v1252_v18 }
  0x36   :  { %228 = vmatprep.mubr.bf16.mxu0 %v2306_v0  ;;  %248 = vmatprep.mubr.bf16.mxu1 %v2306_v0 }
  0x3d   :  { %229 = vmatmul.mubr.bf16.gmra.mrb[4].mxu0 %v1253_v19  ;;  %249 = vmatmul.mubr.bf16.gmra.mrb[4].mxu1 %v1254_v20 }
 0x108   :  { %v220_v24 = vpop.f32.mrb[0].mxu0  ;;  %v240_v25 = vpop.f32.mrb[0].mxu1 }
 0x109   :  { %v1460_v26 = vmul.f32 14.285714, %v220_v24  ;;  %v222_v27 = vpop.f32.mrb[1].mxu0  ;;  %v1462_v28 = vmul.f32 14.285714, %v240_v25  ;;  %v242_v29 = vpop.f32.mrb[1].mxu1 }
 0x10a   :  { %v1464_v30 = vmul.f32 14.285714, %v222_v27  ;;  %v224_v31 = vpop.f32.mrb[2].mxu0  ;;  %v1466_v32 = vmul.f32 14.285714, %v242_v29  ;;  %v244_v33 = vpop.f32.mrb[2].mxu1 }
 0x10b   :  { %2327 = vst [vmem:[#allocation9_spill] sm:$0xff] %v1462_v28  ;;  %v226_v34 = vpop.f32.mrb[3].mxu0  ;;  %v246_v35 = vpop.f32.mrb[3].mxu1  ;;  %v1471_v36 = vsel %vm2312_vm1, %v1460_v26, -inf  ;;  %v1483_v38 = vsel %vm2312_vm1, %v1462_v28, -inf  ;;  %v1628_v24 = vld [vmem:[#allocation2 + $0x8] sm:$0xff] }
 0x10c   :  { %2328 = vst [vmem:[#allocation10_spill] sm:$0xff] %v1466_v32  ;;  %v1476_v37 = vsel %vm2312_vm1, %v1464_v30, -inf  ;;  %328 = vmax.xlane.f32.xlu0 %v1471_v36  ;;  %v1488_v39 = vsel %vm2312_vm1, %v1466_v32, -inf  ;;  %v1490_v40 = vmul.f32 14.285714, %v224_v31  ;;  %v1637_v31 = vld [vmem:[#allocation2 + $0x28] sm:$0xff] }
 0x10d   :  { %570 = vmax.xlane.f32.xlu1 %v1476_v37  ;;  %v1492_v41 = vmul.f32 14.285714, %v244_v33  ;;  %v1498_v51 = vmul.f32 14.285714, %v226_v34  ;;  %v1519_v56 = vmul.f32 14.285714, %v246_v35 }
 0x10e   :  { %v1503_v52 = vsel %vm2312_vm1, %v1490_v40, -inf  ;;  %v2331_v28 = vmov 0  }
 0x10f   :  { %v1508_v53 = vsel %vm2312_vm1, %v1492_v41, -inf  ;;  %v1524_v57 = vsel %vm2312_vm1, %v1498_v51, -inf  ;;  %v1540_v61 = vsel %vm2312_vm1, %v1519_v56, -inf }
 0x110   :  { %v230_v42 = vpop.f32.mrb[4].mxu0  ;;  %v250_v43 = vpop.f32.mrb[4].mxu1  ;;  %336 = vmax.xlane.f32.xlu0 %v1483_v38 }
 0x111   :  { %578 = vmax.xlane.f32.xlu1 %v1488_v39  ;;  %v232_v44 = vpop.f32.mrb[5].mxu0  ;;  %v252_v45 = vpop.f32.mrb[5].mxu1  ;;  %v1496_v46 = vmul.f32 14.285714, %v230_v42  ;;  %v1528_v58 = vmul.f32 14.285714, %v250_v43 }
 0x112   :  { %v234_v47 = vpop.f32.mrb[6].mxu0  ;;  %v254_v48 = vpop.f32.mrb[6].mxu1  ;;  %v1517_v55 = vmul.f32 14.285714, %v232_v44  ;;  %v1530_v59 = vmul.f32 14.285714, %v252_v45 }
 0x113   :  { %v236_v49 = vpop.f32.mrb[7].mxu0  ;;  %v256_v50 = vpop.f32.mrb[7].mxu1  ;;  %v1515_v54 = vsel %vm2312_vm1, %v1496_v46, -inf  ;;  %2329 = vst [vmem:[#allocation11_spill] sm:$0xff] %v1528_v58  ;;  %v1547_v62 = vsel %vm2312_vm1, %v1528_v58, -inf  ;;  %v1651_v45 = vld [vmem:[#allocation2 + $0x10] sm:$0xff] }
 0x114   :  { %330 = vmax.xlane.f32.xlu0 %v1503_v52  ;;  %2330 = vst [vmem:[#allocation12_spill] sm:$0xff] %v1530_v59  ;;  %v1535_v60 = vsel %vm2312_vm1, %v1517_v55, -inf  ;;  %v1552_v63 = vsel %vm2312_vm1, %v1530_v59, -inf  ;;  %v1554_v1 = vmul.f32 14.285714, %v234_v47 }
 0x115   :  { %338 = vmax.xlane.f32.xlu1 %v1508_v53  ;;  %v1556_v2 = vmul.f32 14.285714, %v236_v49  ;;  %v1560_v3 = vmul.f32 14.285714, %v254_v48  ;;  %v1567_v5 = vmul.f32 14.285714, %v256_v50 }
 0x116   :  { %v1565_v4 = vsel %vm2312_vm1, %v1554_v1, -inf }
 0x117   :  { %v1572_v6 = vsel %vm2312_vm1, %v1556_v2, -inf  ;;  %v1579_v7 = vsel %vm2312_vm1, %v1560_v3, -inf  ;;  %v1584_v8 = vsel %vm2312_vm1, %v1567_v5, -inf }
 0x118   :  { %572 = vmax.xlane.f32.xlu0 %v1524_v57 }
 0x119   :  { %332 = vmax.xlane.f32.xlu1 %v1515_v54 }
 0x11c   :  { %580 = vmax.xlane.f32.xlu0 %v1540_v61 }
 0x11d   :  { %574 = vmax.xlane.f32.xlu1 %v1535_v60 }
 0x120   :  { %340 = vmax.xlane.f32.xlu0 %v1547_v62 }
 0x121   :  { %582 = vmax.xlane.f32.xlu1 %v1552_v63 }
 0x124   :  { %576 = vmax.xlane.f32.xlu0 %v1572_v6 }
 0x125   :  { %334 = vmax.xlane.f32.xlu1 %v1565_v4 }
 0x128   :  { %584 = vmax.xlane.f32.xlu0 %v1584_v8 }
 0x129   :  { %342 = vmax.xlane.f32.xlu1 %v1579_v7 }
 0x199   :  { %v329_v11 = vpop.xlane.xlu0 %328 }
 0x19a   :  { %v571_v12 = vpop.xlane.xlu1 %570  ;;  %v1607_v13 = vmax.f32 %v1604_v10, %v329_v11 }
 0x19c   :  { %v360_v15 = vsub.f32 %v1604_v10, %v1607_v13  ;;  %v1614_v16 = vmax.f32 %v1607_v13, %v571_v12  ;;  %394 = vperm.xlu0 %1225, %v1607_v13   ;;  %vm352_vm2 = vcmp.eq.f32.partialorder %v1604_v10, %v1607_v13 }
 0x19d   :  { %v337_v17 = vpop.xlane.xlu0 %336 }
 0x19e   :  { %v579_v18 = vpop.xlane.xlu1 %578  ;;  %v368_v19 = vmul.f32 1.442695, %v360_v15  ;;  %v602_v20 = vsub.f32 %v1607_v13, %v1614_v16  ;;  %795 = vst.msk [vmem:[#allocation2] sm:$0xff] %vm2323_vm0, %v1614_v16  ;;  %v1624_v21 = vmax.f32 %v1609_v14, %v337_v17  ;;  %vm594_vm3 = vcmp.eq.f32.partialorder %v1607_v13, %v1614_v16 }
 0x1a0   :  { %1255 = vpow2.f32 %v368_v19  ;;  %v610_v25 = vmul.f32 1.442695, %v602_v20  ;;  %v364_v27 = vsub.f32 %v1609_v14, %v1624_v21  ;;  %v1633_v29 = vmax.f32 %v1624_v21, %v579_v18  ;;  %414 = vperm.xlu1 %1226, %v1624_v21   ;;  %636 = vperm.xlu0 %1225, %v1614_v16  }
 0x1a1   :  { %v331_v33 = vpop.xlane.xlu0 %330  ;;  %vm356_vm4 = vcmp.eq.f32.partialorder %v1609_v14, %v1624_v21 }
 0x1a2   :  { %v339_v34 = vpop.xlane.xlu1 %338  ;;  %1257 = vpow2.f32 %v610_v25  ;;  %v376_v35 = vmul.f32 1.442695, %v364_v27  ;;  %v606_v42 = vsub.f32 %v1624_v21, %v1633_v29  ;;  %799 = vst.msk [vmem:[#allocation2 + $0x20] sm:$0xff] %vm2323_vm0, %v1633_v29  ;;  %v1646_v43 = vmax.f32 %v1628_v24, %v331_v33 }
 0x1a3   :  { %v1649_v44 = vmax.f32 %v1637_v31, %v339_v34  ;;  %vm598_vm5 = vcmp.eq.f32.partialorder %v1624_v21, %v1633_v29 }
 0x1a4   :  { %1259 = vpow2.f32 %v376_v35  ;;  %v618_v47 = vmul.f32 1.442695, %v606_v42  ;;  %v361_v48 = vsub.f32 %v1628_v24, %v1646_v43  ;;  %399 = vperm.xlu1 %1226, %v1646_v43   ;;  %vm353_vm6 = vcmp.eq.f32.partialorder %v1628_v24, %v1646_v43 }
 0x1a5   :  { %v365_v49 = vsub.f32 %v1637_v31, %v1649_v44  ;;  %v573_v50 = vpop.xlane.xlu0 %572  ;;  %vm357_vm7 = vcmp.eq.f32.partialorder %v1637_v31, %v1649_v44 }
 0x1a6   :  { %v333_v11 = vpop.xlane.xlu1 %332  ;;  %1261 = vpow2.f32 %v618_v47  ;;  %v370_v12 = vmul.f32 1.442695, %v361_v48  ;;  %v1665_v15 = vmax.f32 %v1646_v43, %v573_v50  ;;  %v1687_v48 = vld [vmem:[#allocation2 + $0x30] sm:$0xff] }
 0x1a7   :  { %v1668_v17 = vmax.f32 %v1651_v45, %v333_v11  ;;  %v378_v18 = vmul.f32 1.442695, %v365_v49 }
 0x1a8   :  { %1263 = vpow2.f32 %v370_v12  ;;  %v603_v19 = vsub.f32 %v1646_v43, %v1665_v15  ;;  %796 = vst.msk [vmem:[#allocation2 + $0x8] sm:$0xff] %vm2323_vm0, %v1665_v15  ;;  %419 = vperm.xlu1 %1226, %v1649_v44   ;;  %vm595_vm8 = vcmp.eq.f32.partialorder %v1646_v43, %v1665_v15 }
 0x1a9   :  { %v362_v20 = vsub.f32 %v1651_v45, %v1668_v17  ;;  %1265 = vpow2.f32 %v378_v18  ;;  %v581_v25 = vpop.xlane.xlu0 %580  ;;  %vm354_vm9 = vcmp.eq.f32.partialorder %v1651_v45, %v1668_v17 }
 0x1aa   :  { %v575_v27 = vpop.xlane.xlu1 %574  ;;  %v1256_v33 = vpop.eup %1255  ;;  %v612_v34 = vmul.f32 1.442695, %v603_v19  ;;  %v1682_v42 = vmax.f32 %v1649_v44, %v581_v25  ;;  %v1706_v19 = vld [vmem:[%s2299_s2] sm:$0xff] }
 0x1ab   :  { %v372_v35 = vmul.f32 1.442695, %v362_v20  ;;  %v1685_v47 = vmax.f32 %v1668_v17, %v575_v27  ;;  %v1692_v49 = vsel %vm352_vm2, 1.0, %v1256_v33  ;;  %vm320_vm12 = vcmp.eq.s32.totalorder %v1706_v19, 0 }
 0x1ac   :  { %v1258_v50 = vpop.eup %1257  ;;  %1267 = vpow2.f32 %v612_v34  ;;  %v607_v11 = vsub.f32 %v1649_v44, %v1682_v42  ;;  %800 = vst.msk [vmem:[#allocation2 + $0x28] sm:$0xff] %vm2323_vm0, %v1682_v42  ;;  %656 = vperm.xlu1 %1226, %v1633_v29   ;;  %vm599_vm10 = vcmp.eq.f32.partialorder %v1649_v44, %v1682_v42  ;;  %v1756_v29 = vld [vmem:[#allocation2 + $0x38] sm:$0xff] }
 0x1ad   :  { %v604_v12 = vsub.f32 %v1668_v17, %v1685_v47  ;;  %797 = vst.msk [vmem:[#allocation2 + $0x10] sm:$0xff] %vm2323_vm0, %v1685_v47  ;;  %1269 = vpow2.f32 %v372_v35  ;;  %v341_v10 = vpop.xlane.xlu0 %340  ;;  %v1711_v20 = vsel %vm594_vm3, 1.0, %v1258_v50  ;;  %vm596_vm11 = vcmp.eq.f32.partialorder %v1668_v17, %v1685_v47  ;;  %v1720_v35 = vld [vmem:[#allocation2 + $0x18] sm:$0xff] }
 0x1ae   :  { %v583_v18 = vpop.xlane.xlu1 %582  ;;  %v1260_v25 = vpop.eup %1259  ;;  %v620_v27 = vmul.f32 1.442695, %v607_v11  ;;  %v1718_v34 = vmax.f32 %v1687_v48, %v341_v10  ;;  %v1737_v11 = vld [vmem:[%s2299_s2 + $0x20] sm:$0xff] }
 0x1af   :  { %v614_v33 = vmul.f32 1.442695, %v604_v12  ;;  %v1725_v13 = vsel %vm356_vm4, 1.0, %v1260_v25  ;;  %vm324_vm15 = vcmp.eq.s32.totalorder %v1737_v11, 0 }
 0x1b0   :  { %v1262_v16 = vpop.eup %1261  ;;  %1271 = vpow2.f32 %v620_v27  ;;  %v366_v50 = vsub.f32 %v1687_v48, %v1718_v34  ;;  %v1730_v9 = vmax.f32 %v1718_v34, %v583_v18  ;;  %641 = vperm.xlu1 %1226, %v1665_v15   ;;  %vm358_vm13 = vcmp.eq.f32.partialorder %v1687_v48, %v1718_v34 }
 0x1b1   :  { %1273 = vpow2.f32 %v614_v33  ;;  %v577_v12 = vpop.xlane.xlu0 %576  ;;  %v1742_v10 = vsel %vm598_vm5, 1.0, %v1262_v16  ;;  %v496_v16 = vsel %vm320_vm12, 1, %v2306_v0  ;;  %v1776_v0 = vld [vmem:[%s2299_s2 + $0x10] sm:$0xff]  ;;  %v500_v31 = vsel %vm324_vm15, 1, %v2331_v28 }
 0x1b2   :  { %v335_v14 = vpop.xlane.xlu1 %334  ;;  %v1264_v18 = vpop.eup %1263  ;;  %v380_v25 = vmul.f32 1.442695, %v366_v50  ;;  %v608_v27 = vsub.f32 %v1718_v34, %v1730_v9  ;;  %801 = vst.msk [vmem:[#allocation2 + $0x30] sm:$0xff] %vm2323_vm0, %v1730_v9  ;;  %666 = vperm.xlu0 %1225, %v1730_v9   ;;  %vm600_vm14 = vcmp.eq.f32.partialorder %v1718_v34, %v1730_v9  ;;  %vm2314_vm3 = vcmp.eq.s32.totalorder %v1776_v0, 1 }
 0x1b3   :  { %v1751_v33 = vmax.f32 %v1720_v35, %v335_v14  ;;  %v1266_v21 = vpop.eup %1265  ;;  %v1765_v50 = vsel %vm353_vm6, 1.0, %v1264_v18 }
 0x1b4   :  { %1275 = vpow2.f32 %v380_v25  ;;  %v622_v14 = vmul.f32 1.442695, %v608_v27  ;;  %661 = vperm.xlu1 %1226, %v1682_v42   ;;  %v1781_v24 = vsel %vm357_vm7, 1.0, %v1266_v21 }
 0x1b5   :  { %v363_v22 = vsub.f32 %v1720_v35, %v1751_v33  ;;  %v1770_v23 = vmax.f32 %v1751_v33, %v577_v12  ;;  %v585_v58 = vpop.xlane.xlu0 %584  ;;  %vm355_vm2 = vcmp.eq.f32.partialorder %v1720_v35, %v1751_v33 }
 0x1b6   :  { %v343_v59 = vpop.xlane.xlu1 %342  ;;  %v1268_v18 = vpop.eup %1267  ;;  %1277 = vpow2.f32 %v622_v14  ;;  %505 = vperm.xlu0 %1225, %v496_v16  }
 0x1b7   :  { %v374_v12 = vmul.f32 1.442695, %v363_v22  ;;  %v605_v25 = vsub.f32 %v1751_v33, %v1770_v23  ;;  %798 = vst.msk [vmem:[#allocation2 + $0x18] sm:$0xff] %vm2323_vm0, %v1770_v23  ;;  %v351_v27 = vmax.f32 %v1756_v29, %v343_v59  ;;  %v1270_v32 = vpop.eup %1269  ;;  %v1797_v22 = vsel %vm595_vm8, 1.0, %v1268_v18 }
 0x1b8   :  { %vm597_vm4 = vcmp.eq.f32.partialorder %v1751_v33, %v1770_v23  ;;  %404 = vperm.xlu1 %1226, %v1668_v17   ;;  %v1808_v14 = vsel %vm354_vm9, 1.0, %v1270_v32  ;;  %v1843_v17 = vld [vmem:[%s2299_s2 + $0x8] sm:$0xff]  ;;  %vm2320_vm8 = vcmp.eq.s32.totalorder %v1776_v0, 0 }
 0x1b9   :  { %1279 = vpow2.f32 %v374_v12  ;;  %v616_v21 = vmul.f32 1.442695, %v605_v25  ;;  %v367_v59 = vsub.f32 %v1756_v29, %v351_v27  ;;  %v1802_v16 = vmax.f32 %v351_v27, %v585_v58 }
 0x1ba   :  { %vm359_vm5 = vcmp.eq.f32.partialorder %v1756_v29, %v351_v27  ;;  %v1272_v43 = vpop.eup %1271  ;;  %517 = vperm.xlu0 %1225, %v500_v31   ;;  %v740_v12 = vsel %vm2314_vm3, 1, %v2331_v28  ;;  %vm321_vm7 = vcmp.eq.s32.totalorder %v1843_v17, 0  ;;  %v1881_v29 = vld [vmem:[%s2299_s2 + $0x28] sm:$0xff]  ;;  %vm566_vm3 = vcmp.eq.s32.totalorder %v1737_v11, 1 }
 0x1bb   :  { %1281 = vpow2.f32 %v616_v21  ;;  %v382_v15 = vmul.f32 1.442695, %v367_v59  ;;  %v609_v18 = vsub.f32 %v351_v27, %v1802_v16  ;;  %802 = vst.msk [vmem:[#allocation2 + $0x38] sm:$0xff] %vm2323_vm0, %v1802_v16  ;;  %v1274_v58 = vpop.eup %1273  ;;  %v1820_v32 = vsel %vm599_vm10, 1.0, %v1272_v43 }
 0x1bc   :  { %vm601_vm6 = vcmp.eq.f32.partialorder %v351_v27, %v1802_v16  ;;  %424 = vperm.xlu1 %1226, %v1718_v34   ;;  %v1827_v25 = vsel %vm596_vm11, 1.0, %v1274_v58  ;;  %v497_v35 = vsel %vm321_vm7, 1, %v2331_v28  ;;  %vm325_vm10 = vcmp.eq.s32.totalorder %v1881_v29, 0 }
 0x1bd   :  { %1283 = vpow2.f32 %v382_v15  ;;  %v624_v45 = vmul.f32 1.442695, %v609_v18 }
 0x1be   :  { %v1276_v31 = vpop.eup %1275  ;;  %753 = vperm.xlu0 %1225, %v740_v12   ;;  %v1890_v12 = vld [vmem:[%s2299_s2 + $0x30] sm:$0xff] }
 0x1bf   :  { %1285 = vpow2.f32 %v624_v45  ;;  %v1832_v44 = vsel %vm358_vm13, 1.0, %v1276_v31  ;;  %v501_v45 = vsel %vm325_vm10, 1, %v2331_v28  ;;  %vm2319_vm11 = vcmp.eq.s32.totalorder %v1890_v12, 0  ;;  %v1899_v31 = vld [vmem:[%s2299_s2 + $0x38] sm:$0xff] }
 0x1c0   :  { %v1278_v42 = vpop.eup %1277  ;;  %409 = vperm.xlu1 %1226, %v1751_v33   ;;  %v1872_v33 = vld [vmem:[%s2299_s2 + $0x18] sm:$0xff]  ;;  %vm2316_vm13 = vcmp.eq.s32.totalorder %v1899_v31, 0  ;;  %vm2315_vm1 = vcmp.eq.s32.totalorder %v1899_v31, 1 }
 0x1c1   :  { %v1838_v21 = vsel %vm600_vm14, 1.0, %v1278_v42  ;;  %vm2317_vm9 = vcmp.eq.s32.totalorder %v1872_v33, 0  ;;  %v502_v42 = vsel %vm2319_vm11, 1, %v2331_v28  ;;  %vm562_vm14 = vcmp.eq.s32.totalorder %v1706_v19, 1 }
 0x1c3   :  { %v1280_v59 = vpop.eup %1279 }
 0x1c4   :  { %v1848_v48 = vsel %vm355_vm2, 1.0, %v1280_v59  ;;  %429 = vperm.xlu1 %1226, %v351_v27   ;;  %v499_v27 = vsel %vm2317_vm9, 1, %v2331_v28  ;;  %v503_v59 = vsel %vm2316_vm13, 1, %v2331_v28  ;;  %vm2322_vm2 = vcmp.eq.s32.totalorder %v1843_v17, 1 }
 0x1c5   :  { %v1282_v43 = vpop.eup %1281 }
 0x1c6   :  { %v1853_v15 = vsel %vm597_vm4, 1.0, %v1282_v43  ;;  %v738_v43 = vsel %vm562_vm14, 1, %v2331_v28  ;;  %vm2313_vm4 = vcmp.eq.s32.totalorder %v1872_v33, 1 }
 0x1c7   :  { %v1284_v9 = vpop.eup %1283 }
 0x1c8   :  { %v1858_v34 = vsel %vm359_vm5, 1.0, %v1284_v9  ;;  %646 = vperm.xlu1 %1226, %v1685_v47   ;;  %v498_v47 = vsel %vm2320_vm8, 1, %v2331_v28  ;;  %v739_v9 = vsel %vm2322_vm2, 1, %v2331_v28  ;;  %vm2321_vm5 = vcmp.eq.s32.totalorder %v1881_v29, 1 }
 0x1c9   :  { %2332 = vst [vmem:[#allocation13_spill] sm:$0xff] %v1858_v34  ;;  %v1286_v18 = vpop.eup %1285  ;;  %vm845_vm8 = vcmp.ge.s32.totalorder %v1737_v11, 0 }
 0x1ca   :  { %v1866_v58 = vsel %vm601_vm6, 1.0, %v1286_v18  ;;  %v741_v18 = vsel %vm2313_vm4, 1, %v2331_v28 }
 0x1cb   :  { %2333 = vst [vmem:[#allocation14_spill] sm:$0xff] %v1866_v58 }
 0x1cc   :  { %508 = vperm.xlu1 %1226, %v497_v35  }
 0x1d0   :  { %511 = vperm.xlu1 %1226, %v498_v47  }
 0x1d4   :  { %514 = vperm.xlu1 %1226, %v499_v27  }
 0x1d8   :  { %520 = vperm.xlu1 %1226, %v501_v45  }
 0x1dc   :  { %523 = vperm.xlu1 %1226, %v502_v42  }
 0x1e0   :  { %526 = vperm.xlu1 %1226, %v503_v59  }
 0x1e4   :  { %747 = vperm.xlu1 %1226, %v738_v43  }
 0x1e8   :  { %750 = vperm.xlu1 %1226, %v739_v9  }
 0x1ec   :  { %756 = vperm.xlu1 %1226, %v741_v18  }
 0x1f0   :  { %651 = vperm.xlu1 %1226, %v1770_v23  }
 0x1f4   :  { %671 = vperm.xlu1 %1226, %v1802_v16  }
 0x21b   :  { %v395_v35 = vpop.permute.xlu0 %394 }
 0x21c   :  { %v432_v47 = vsub.f32 %v1471_v36, %v395_v35 }
 0x21e   :  { %v440_v27 = vmul.f32 1.442695, %v432_v47 }
 0x21f   :  { %v415_v45 = vpop.permute.xlu1 %414  ;;  %v1923_v42 = vpop.permute.xlu0 %636 }
 0x220   :  { %1287 = vpow2.f32 %v440_v27  ;;  %v436_v59 = vsub.f32 %v1483_v38, %v415_v45  ;;  %v674_v43 = vsub.f32 %v1476_v37, %v1923_v42 }
 0x222   :  { %v448_v9 = vmul.f32 1.442695, %v436_v59  ;;  %v682_v58 = vmul.f32 1.442695, %v674_v43 }
 0x223   :  { %v400_v18 = vpop.permute.xlu1 %399 }
 0x224   :  { %1289 = vpow2.f32 %v448_v9  ;;  %v433_v23 = vsub.f32 %v1503_v52, %v400_v18 }
 0x225   :  { %1291 = vpow2.f32 %v682_v58 }
 0x226   :  { %v442_v16 = vmul.f32 1.442695, %v433_v23 }
 0x227   :  { %v420_v34 = vpop.permute.xlu1 %419 }
 0x228   :  { %1293 = vpow2.f32 %v442_v16  ;;  %v437_v36 = vsub.f32 %v1508_v53, %v420_v34 }
 0x22a   :  { %v1288_v35 = vpop.eup %1287  ;;  %v450_v47 = vmul.f32 1.442695, %v437_v36 }
 0x22b   :  { %v1930_v27 = vpop.permute.xlu1 %656  ;;  %456 = vadd.xlane.f32.xlu0 %v1288_v35 }
 0x22c   :  { %1295 = vpow2.f32 %v450_v47  ;;  %v678_v37 = vsub.f32 %v1488_v39, %v1930_v27 }
 0x22e   :  { %v1290_v38 = vpop.eup %1289  ;;  %v690_v45 = vmul.f32 1.442695, %v678_v37 }
 0x22f   :  { %464 = vadd.xlane.f32.xlu1 %v1290_v38  ;;  %v1934_v59 = vpop.permute.xlu1 %641  ;;  %v1292_v58 = vpop.eup %1291 }
 0x230   :  { %1297 = vpow2.f32 %v690_v45  ;;  %v675_v52 = vsub.f32 %v1524_v57, %v1934_v59 }
 0x231   :  { %v1943_v36 = vpop.permute.xlu0 %666 }
 0x232   :  { %v1294_v53 = vpop.eup %1293  ;;  %v684_v34 = vmul.f32 1.442695, %v675_v52 }
 0x233   :  { %v1938_v43 = vpop.permute.xlu1 %661  ;;  %458 = vadd.xlane.f32.xlu0 %v1294_v53  ;;  %698 = vadd.xlane.f32.xlu1 %v1292_v58 }
 0x234   :  { %1299 = vpow2.f32 %v684_v34  ;;  %v679_v39 = vsub.f32 %v1540_v61, %v1938_v43 }
 0x235   :  { %v506_v52 = vpop.permute.xlu0 %505 }
 0x236   :  { %v1296_v9 = vpop.eup %1295  ;;  %v692_v18 = vmul.f32 1.442695, %v679_v39 }
 0x237   :  { %v405_v23 = vpop.permute.xlu1 %404  ;;  %466 = vadd.xlane.f32.xlu0 %v1296_v9 }
 0x238   :  { %1301 = vpow2.f32 %v692_v18  ;;  %v434_v16 = vsub.f32 %v1515_v54, %v405_v23 }
 0x239   :  { %v1947_v39 = vpop.permute.xlu0 %517 }
 0x23a   :  { %v1298_v57 = vpop.eup %1297  ;;  %v444_v35 = vmul.f32 1.442695, %v434_v16 }
 0x23b   :  { %v425_v47 = vpop.permute.xlu1 %424  ;;  %706 = vadd.xlane.f32.xlu1 %v1298_v57 }
 0x23c   :  { %1303 = vpow2.f32 %v444_v35  ;;  %v438_v37 = vsub.f32 %v1547_v62, %v425_v47 }
 0x23d   :  { %v754_v62 = vpop.permute.xlu0 %753 }
 0x23e   :  { %v1300_v38 = vpop.eup %1299  ;;  %v452_v45 = vmul.f32 1.442695, %v438_v37  ;;  %vm772_vm6 = vcmp.eq.s32.totalorder %v754_v62, 1 }
 0x23f   :  { %v410_v61 = vpop.permute.xlu1 %409  ;;  %700 = vadd.xlane.f32.xlu1 %v1300_v38  ;;  %v780_v47 = vsel %vm772_vm6, %v1517_v55, 0.0  ;;  %v745_v38 = vsel %vm2315_vm1, 1, %v2331_v28  ;;  %vm528_vm6 = vcmp.eq.s32.totalorder %v506_v52, 1 }
 0x240   :  { %1305 = vpow2.f32 %v452_v45  ;;  %v435_v58 = vsub.f32 %v1565_v4, %v410_v61  ;;  %v743_v4 = vsel %vm2321_vm5, 1, %v2331_v28  ;;  %vm853_vm5 = vcmp.lt.s32.totalorder %v1737_v11, 2 }
 0x242   :  { %v1302_v53 = vpop.eup %1301  ;;  %v446_v34 = vmul.f32 1.442695, %v435_v58 }
 0x243   :  { %v430_v54 = vpop.permute.xlu1 %429  ;;  %708 = vadd.xlane.f32.xlu0 %v1302_v53 }
 0x244   :  { %1307 = vpow2.f32 %v446_v34  ;;  %v439_v62 = vsub.f32 %v1579_v7, %v430_v54 }
 0x246   :  { %v1304_v9 = vpop.eup %1303 }
 0x247   :  { %v647_v18 = vpop.permute.xlu1 %646  ;;  %460 = vadd.xlane.f32.xlu0 %v1304_v9 }
 0x24a   :  { %v1306_v23 = vpop.eup %1305 }
 0x24b   :  { %v509_v16 = vpop.permute.xlu1 %508  ;;  %468 = vadd.xlane.f32.xlu0 %v1306_v23  ;;  %v536_v23 = vsel %vm528_vm6, %v1460_v26, 0.0 }
 0x24c   :  { %vm529_vm13 = vcmp.eq.s32.totalorder %v509_v16, 1  ;;  %v680_v16 = vsub.f32 %v1552_v63, %v1943_v36 }
 0x24d   :  { %v537_v26 = vsel %vm529_vm13, %v1490_v40, 0.0  ;;  %vm849_vm13 = vcmp.lt.s32.totalorder %v1706_v19, 2 }
 0x24e   :  { %v1308_v57 = vpop.eup %1307 }
 0x24f   :  { %v512_v35 = vpop.permute.xlu1 %511  ;;  %462 = vadd.xlane.f32.xlu0 %v1308_v57 }
 0x250   :  { %vm530_vm4 = vcmp.eq.s32.totalorder %v512_v35, 1  ;;  %762 = vperm.xlu1 %1226, %v743_v4  }
 0x251   :  { %v538_v37 = vsel %vm530_vm4, %v1496_v46, 0.0  ;;  %v742_v46 = vsel %vm566_vm3, 1, %v2331_v28  ;;  %vm2318_vm4 = vcmp.eq.s32.totalorder %v1890_v12, 1 }
 0x252   :  { %v788_v45 = vadd.f32 %v780_v47, %v538_v37  ;;  %v744_v52 = vsel %vm2318_vm4, 1, %v2331_v28  ;;  %v865_v47 = vmul.u32 64, %v1706_v19  ;;  %v454_v37 = vmul.f32 1.442695, %v439_v62 }
 0x253   :  { %v515_v61 = vpop.permute.xlu1 %514  ;;  %vm851_vm4 = vcmp.lt.s32.totalorder %v1776_v0, 2 }
 0x254   :  { %v1959_v58 = vsub.f32 %v788_v45, %v647_v18  ;;  %768 = vperm.xlu1 %1226, %v745_v38   ;;  %v676_v38 = vsub.f32 %v1535_v60, %v647_v18  ;;  %1309 = vpow2.f32 %v454_v37 }
 0x257   :  { %v1961_v53 = vpop.permute.xlu1 %520 }
 0x25b   :  { %v1963_v34 = vpop.permute.xlu1 %523 }
 0x25f   :  { %v1965_v9 = vpop.permute.xlu1 %526 }
 0x263   :  { %v748_v55 = vpop.permute.xlu1 %747 }
 0x264   :  { %vm770_vm1 = vcmp.eq.s32.totalorder %v748_v55, 1  ;;  %v686_v55 = vmul.f32 1.442695, %v676_v38 }
 0x265   :  { %v778_v4 = vsel %vm770_vm1, %v1464_v30, 0.0  ;;  %759 = vperm.xlu0 %1225, %v742_v46   ;;  %vm531_vm1 = vcmp.eq.s32.totalorder %v515_v61, 1  ;;  %v867_v46 = vmul.u32 64, %v1776_v0 }
 0x266   :  { %v1975_v57 = vadd.f32 %v778_v4, %v536_v23  ;;  %v539_v60 = vsel %vm531_vm1, %v1554_v1, 0.0  ;;  %v694_v23 = vmul.f32 1.442695, %v680_v16  ;;  %1311 = vpow2.f32 %v686_v55 }
 0x267   :  { %v751_v35 = vpop.permute.xlu1 %750  ;;  %v871_v4 = vmul.u32 64, %v1890_v12  ;;  %v870_v16 = vmul.u32 64, %v1881_v29 }
 0x268   :  { %vm771_vm9 = vcmp.eq.s32.totalorder %v751_v35, 1  ;;  %1313 = vpow2.f32 %v694_v23 }
 0x269   :  { %v779_v7 = vsel %vm771_vm9, %v1498_v51, 0.0  ;;  %765 = vperm.xlu0 %1225, %v744_v52   ;;  %vm841_vm9 = vcmp.ge.s32.totalorder %v1706_v19, 0  ;;  %v1310_v52 = vpop.eup %1309 }
 0x26a   :  { %v787_v30 = vadd.f32 %v779_v7, %v537_v26  ;;  %vm857_vm1 = vmand %vm841_vm9, %vm849_vm13  ;;  %vm852_vm13 = vcmp.lt.s32.totalorder %v1872_v33, 2 }
 0x26b   :  { %v757_v54 = vpop.permute.xlu1 %756  ;;  %v921_v35 = vsel %vm857_vm1, 1, %v2331_v28  ;;  %vm861_vm9 = vmand %vm845_vm8, %vm853_vm5  ;;  %vm850_vm8 = vcmp.lt.s32.totalorder %v1843_v17, 2 }
 0x26c   :  { %v1987_v45 = vsub.f32 %v787_v30, %v1934_v59  ;;  %vm773_vm6 = vcmp.eq.s32.totalorder %v757_v54, 1  ;;  %v869_v59 = vmul.u32 64, %v1737_v11  ;;  %v925_v38 = vsel %vm861_vm9, 1, %v2331_v28 }
 0x26d   :  { %v781_v40 = vsel %vm773_vm6, %v1556_v2, 0.0  ;;  %874 = vperm.xlu0 %1225, %v865_v47   ;;  %vm843_vm6 = vcmp.ge.s32.totalorder %v1776_v0, 0  ;;  %v866_v30 = vmul.u32 64, %v1843_v17  ;;  %v868_v54 = vmul.u32 64, %v1872_v33 }
 0x26e   :  { %v789_v51 = vadd.f32 %v781_v40, %v539_v60  ;;  %vm859_vm11 = vmand %vm843_vm6, %vm851_vm4  ;;  %vm844_vm4 = vcmp.ge.s32.totalorder %v1872_v33, 0  ;;  %vm846_vm6 = vcmp.ge.s32.totalorder %v1881_v29, 0  ;;  %vm854_vm9 = vcmp.lt.s32.totalorder %v1881_v29, 2 }
 0x26f   :  { %v652_v18 = vpop.permute.xlu1 %651  ;;  %vm860_vm1 = vmand %vm844_vm4, %vm852_vm13  ;;  %vm534_vm13 = vcmp.eq.s32.totalorder %v1963_v34, 1 }
 0x270   :  { %v1992_v61 = vsub.f32 %v789_v51, %v652_v18  ;;  %v677_v63 = vsub.f32 %v1572_v6, %v652_v18  ;;  %v1312_v47 = vpop.eup %1311  ;;  %v924_v60 = vsel %vm860_vm1, 1, %v2331_v28  ;;  %vm862_vm2 = vmand %vm846_vm6, %vm854_vm9  ;;  %v294_v51 = vld [vmem:[#allocation3] sm:$0xff]  ;;  %vm1397_vm9 = vmmov 1  }
 0x271   :  { %880 = vperm.xlu0 %1225, %v867_v46   ;;  %v872_v46 = vmul.u32 64, %v1899_v31  ;;  %v926_v40 = vsel %vm862_vm2, 1, %v2331_v28  ;;  %v472_v23 = vmul.f32 %v1692_v49, %v294_v51  ;;  %vm2336_vm2 = vcmp.eq.s32.totalorder %v1776_v0, 0 }
 0x272   :  { %v688_v1 = vmul.f32 1.442695, %v677_v63  ;;  %v1314_v37 = vpop.eup %1313 }
 0x273   :  { %v1996_v62 = vpop.permute.xlu1 %671 }
 0x274   :  { %v681_v2 = vsub.f32 %v1584_v8, %v1996_v62  ;;  %1315 = vpow2.f32 %v688_v1  ;;  %v923_v8 = vsel %vm859_vm11, 1, %v2331_v28  ;;  %vm842_vm11 = vcmp.ge.s32.totalorder %v1843_v17, 0 }
 0x275   :  { %886 = vperm.xlu0 %1225, %v869_v59   ;;  %vm858_vm5 = vmand %vm842_vm11, %vm850_vm8  ;;  %v298_v59 = vld [vmem:[#allocation3 + $0x20] sm:$0xff]  ;;  %vm2337_vm11 = vcmp.eq.s32.totalorder %v1890_v12, 0  ;;  %vm2338_vm8 = vcmp.eq.s32.totalorder %v1872_v33, 0 }
 0x276   :  { %v696_v6 = vmul.f32 1.442695, %v681_v2  ;;  %v922_v55 = vsel %vm858_vm5, 1, %v2331_v28  ;;  %v476_v2 = vmul.f32 %v1725_v13, %v298_v59  ;;  %vm532_vm5 = vcmp.eq.s32.totalorder %v1947_v39, 1 }
 0x278   :  { %470 = vadd.xlane.f32.xlu1 %v1310_v52  ;;  %1317 = vpow2.f32 %v696_v6 }
 0x279   :  { %892 = vperm.xlu0 %1225, %v871_v4  }
 0x27c   :  { %702 = vadd.xlane.f32.xlu1 %v1312_v47 }
 0x27d   :  { %930 = vperm.xlu0 %1225, %v921_v35   ;;  %v295_v35 = vld [vmem:[#allocation3 + $0x8] sm:$0xff] }
 0x27e   :  { %v1316_v26 = vpop.eup %1315 }
 0x280   :  { %710 = vadd.xlane.f32.xlu1 %v1314_v37  ;;  %v473_v37 = vmul.f32 %v1765_v50, %v295_v35 }
 0x281   :  { %936 = vperm.xlu0 %1225, %v923_v8  }
 0x282   :  { %v1318_v7 = vpop.eup %1317 }
 0x284   :  { %704 = vadd.xlane.f32.xlu1 %v1316_v26 }
 0x285   :  { %942 = vperm.xlu0 %1225, %v925_v38  }
 0x288   :  { %712 = vadd.xlane.f32.xlu1 %v1318_v7  ;;  %v299_v7 = vld [vmem:[#allocation3 + $0x28] sm:$0xff] }
 0x299   :  { %877 = vperm.xlu1 %1226, %v866_v30  }
 0x29d   :  { %883 = vperm.xlu1 %1226, %v868_v54   ;;  %v477_v54 = vmul.f32 %v1781_v24, %v299_v7 }
 0x2a1   :  { %889 = vperm.xlu1 %1226, %v870_v16  }
 0x2a5   :  { %895 = vperm.xlu1 %1226, %v872_v46  }
 0x2a9   :  { %933 = vperm.xlu1 %1226, %v922_v55  }
 0x2ad   :  { %939 = vperm.xlu1 %1226, %v924_v60  }
 0x2b1   :  { %945 = vperm.xlu1 %1226, %v926_v40  }
 0x2b8   :  { %v457_v18 = vpop.xlane.xlu0 %456 }
 0x2b9   :  { %v480_v63 = vsel %vm320_vm12, 0.0, %v457_v18  ;;  %vm2334_vm12 = vcmp.eq.s32.totalorder %v1843_v17, 1 }
 0x2ba   :  { %v488_v1 = vadd.f32 %v480_v63, %v472_v23 }
 0x2bc   :  { %v465_v4 = vpop.xlane.xlu1 %464  ;;  %v714_v52 = vmul.f32 %v1711_v20, %v488_v1 }
 0x2bd   :  { %v484_v6 = vsel %vm324_vm15, 0.0, %v465_v4  ;;  %vm533_vm15 = vcmp.eq.s32.totalorder %v1961_v53, 1 }
 0x2be   :  { %v492_v47 = vadd.f32 %v484_v6, %v476_v2  ;;  %v541_v63 = vsel %vm533_vm15, %v1492_v41, 0.0  ;;  %vm2348_vm15 = vcmp.eq.s32.totalorder %v1899_v31, 0 }
 0x2c0   :  { %v699_v8 = vpop.xlane.xlu1 %698  ;;  %v459_v38 = vpop.xlane.xlu0 %458  ;;  %v718_v49 = vmul.f32 %v1742_v10, %v492_v47 }
 0x2c1   :  { %v722_v26 = vsel %vm562_vm14, 0.0, %v699_v8  ;;  %v481_v13 = vsel %vm321_vm7, 0.0, %v459_v38 }
 0x2c2   :  { %v730_v30 = vadd.f32 %v722_v26, %v714_v52  ;;  %v489_v20 = vadd.f32 %v481_v13, %v473_v37  ;;  %v300_v52 = vld [vmem:[#allocation3 + $0x30] sm:$0xff]  ;;  %v297_v37 = vld [vmem:[#allocation3 + $0x18] sm:$0xff] }
 0x2c3   :  { %v478_v35 = vmul.f32 %v1832_v44, %v300_v52 }
 0x2c4   :  { %803 = vst.msk [vmem:[#allocation3] sm:$0xff] %vm2323_vm0, %v730_v30  ;;  %v467_v16 = vpop.xlane.xlu0 %466  ;;  %1003 = vperm.xlu0 %1225, %v730_v30   ;;  %v715_v50 = vmul.f32 %v1797_v22, %v489_v20  ;;  %v2340_v20 = vld [vmem:[#allocation10_spill] sm:$0xff] }
 0x2c5   :  { %v485_v10 = vsel %vm325_vm10, 0.0, %v467_v16  ;;  %vm2335_vm10 = vcmp.eq.s32.totalorder %v1881_v29, 1 }
 0x2c6   :  { %v493_v46 = vadd.f32 %v485_v10, %v477_v54  ;;  %v2342_v10 = vld [vmem:[#allocation12_spill] sm:$0xff] }
 0x2c8   :  { %v707_v19 = vpop.xlane.xlu1 %706  ;;  %v719_v55 = vmul.f32 %v1820_v32, %v493_v46  ;;  %v296_v32 = vld [vmem:[#allocation3 + $0x10] sm:$0xff] }
 0x2c9   :  { %v726_v60 = vsel %vm566_vm3, 0.0, %v707_v19  ;;  %vm535_vm3 = vcmp.eq.s32.totalorder %v1965_v9, 1  ;;  %v474_v2 = vmul.f32 %v1808_v14, %v296_v32 }
 0x2ca   :  { %v734_v40 = vadd.f32 %v726_v60, %v718_v49  ;;  %v543_v41 = vsel %vm535_vm3, %v1560_v3, 0.0  ;;  %v475_v49 = vmul.f32 %v1848_v48, %v297_v37  ;;  %v2343_v60 = vlaneseq }
 0x2cb   :  { %vm855_vm3 = vcmp.lt.s32.totalorder %v1890_v12, 2 }
 0x2cc   :  { %807 = vst.msk [vmem:[#allocation3 + $0x20] sm:$0xff] %vm2323_vm0, %v734_v40  ;;  %v701_v51 = vpop.xlane.xlu1 %700  ;;  %1023 = vperm.xlu0 %1225, %v734_v40   ;;  %v2086_v40 = vshrl.u32 %v2343_v60, 7 }
 0x2cd   :  { %v723_v24 = vsel %vm2334_vm12, 0.0, %v701_v51 }
 0x2ce   :  { %v731_v18 = vadd.f32 %v723_v24, %v715_v50  ;;  %v830_v51 = vadd.s32 48, %v2086_v40  ;;  %v2344_v24 = vld [vmem:[#allocation8_spill] sm:$0xff] }
 0x2d0   :  { %804 = vst.msk [vmem:[#allocation3 + $0x8] sm:$0xff] %vm2323_vm0, %v731_v18  ;;  %v763_v22 = vpop.permute.xlu1 %762  ;;  %1008 = vperm.xlu1 %1226, %v731_v18   ;;  %v709_v23 = vpop.xlane.xlu0 %708 }
 0x2d1   :  { %vm775_vm7 = vcmp.eq.s32.totalorder %v763_v22, 1  ;;  %v727_v11 = vsel %vm2335_vm10, 0.0, %v709_v23  ;;  %v301_v23 = vld [vmem:[#allocation3 + $0x38] sm:$0xff]  ;;  %vm847_vm10 = vcmp.ge.s32.totalorder %v1890_v12, 0 }
 0x2d2   :  { %v783_v59 = vsel %vm775_vm7, %v1519_v56, 0.0  ;;  %v735_v1 = vadd.f32 %v727_v11, %v719_v55  ;;  %v2347_v11 = vld [vmem:[#allocation13_spill] sm:$0xff]  ;;  %vm2350_vm7 = vcmp.eq.s32.totalorder %v1776_v0, 1 }
 0x2d3   :  { %v2054_v17 = vadd.f32 %v783_v59, %v541_v63  ;;  %v479_v32 = vmul.f32 %v2347_v11, %v301_v23  ;;  %v828_v23 = vadd.s32 32, %v2086_v40 }
 0x2d4   :  { %808 = vst.msk [vmem:[#allocation3 + $0x28] sm:$0xff] %vm2323_vm0, %v735_v1  ;;  %v769_v53 = vpop.permute.xlu1 %768  ;;  %1028 = vperm.xlu1 %1226, %v735_v1   ;;  %v461_v4 = vpop.xlane.xlu0 %460 }
 0x2d5   :  { %vm777_vm14 = vcmp.eq.s32.totalorder %v769_v53, 1  ;;  %v482_v29 = vsel %vm2336_vm2, 0.0, %v461_v4  ;;  %vm863_vm2 = vmand %vm847_vm10, %vm855_vm3 }
 0x2d6   :  { %v785_v56 = vsel %vm777_vm14, %v1567_v5, 0.0  ;;  %v490_v6 = vadd.f32 %v482_v29, %v474_v2  ;;  %v2349_v2 = vld [vmem:[#allocation14_spill] sm:$0xff]  ;;  %vm2351_vm14 = vcmp.eq.s32.totalorder %v1890_v12, 1 }
 0x2d7   :  { %v2062_v9 = vadd.f32 %v785_v56, %v543_v41 }
 0x2d8   :  { %v469_v47 = vpop.xlane.xlu0 %468  ;;  %v716_v8 = vmul.f32 %v1827_v25, %v490_v6  ;;  %v2339_v25 = vld [vmem:[#allocation9_spill] sm:$0xff] }
 0x2d9   :  { %v486_v14 = vsel %vm2337_vm11, 0.0, %v469_v47  ;;  %v540_v30 = vsel %vm532_vm5, %v2339_v25, 0.0  ;;  %vm2352_vm11 = vcmp.eq.s32.totalorder %v1872_v33, 1  ;;  %v927_v47 = vsel %vm863_vm2, 1, %v2331_v28 }
 0x2da   :  { %v494_v38 = vadd.f32 %v486_v14, %v478_v35  ;;  %vm856_vm5 = vcmp.lt.s32.totalorder %v1899_v31, 2 }
 0x2dc   :  { %v463_v26 = vpop.xlane.xlu0 %462  ;;  %v720_v3 = vmul.f32 %v1838_v21, %v494_v38  ;;  %v2341_v21 = vld [vmem:[#allocation11_spill] sm:$0xff] }
 0x2dd   :  { %v483_v5 = vsel %vm2338_vm8, 0.0, %v463_v26  ;;  %v542_v50 = vsel %vm534_vm13, %v2341_v21, 0.0  ;;  %vm848_vm8 = vcmp.ge.s32.totalorder %v1899_v31, 0 }
 0x2de   :  { %v491_v13 = vadd.f32 %v483_v5, %v475_v49  ;;  %vm864_vm13 = vmand %vm848_vm8, %vm856_vm5  ;;  %vm2356_vm8 = vcmp.lt.s32.totalorder %v2344_v24, 64 }
 0x2df   :  { %v928_v38 = vsel %vm864_vm13, 1, %v2331_v28 }
 0x2e0   :  { %v717_v7 = vmul.f32 %v1853_v15, %v491_v13  ;;  %v831_v13 = vadd.s32 56, %v2086_v40 }
 0x2e4   :  { %v760_v44 = vpop.permute.xlu0 %759 }
 0x2e5   :  { %vm774_vm4 = vcmp.eq.s32.totalorder %v760_v44, 1  ;;  %v826_v44 = vadd.s32 16, %v2086_v40 }
 0x2e6   :  { %v782_v54 = vsel %vm774_vm4, %v2340_v20, 0.0  ;;  %vm2353_vm4 = vcmp.eq.s32.totalorder %v1899_v31, 1 }
 0x2e7   :  { %v2077_v48 = vadd.f32 %v782_v54, %v540_v30  ;;  %v2354_v30 = vmov 0  ;;  %v827_v54 = vadd.s32 24, %v2086_v40 }
 0x2e8   :  { %v766_v16 = vpop.permute.xlu0 %765 }
 0x2e9   :  { %vm776_vm1 = vcmp.eq.s32.totalorder %v766_v16, 1 }
 0x2ea   :  { %v784_v46 = vsel %vm776_vm1, %v2342_v10, 0.0 }
 0x2eb   :  { %v2081_v19 = vadd.f32 %v784_v46, %v542_v50  ;;  %v825_v50 = vadd.s32 8, %v2086_v40  ;;  %v2357_v46 = vmov 0 }
 0x2ec   :  { %v875_v15 = vpop.permute.xlu0 %874 }
 0x2f0   :  { %v881_v39 = vpop.permute.xlu0 %880 }
 0x2f1   :  { %v899_v25 = vadd.s32 %v881_v39, %v2344_v24 }
 0x2f3   :  { %vm907_vm10 = vcmp.eq.s32.totalorder %v899_v25, %v826_v44 }
 0x2f4   :  { %v2083_v55 = vpop.permute.xlu0 %886 }
 0x2f5   :  { %v901_v11 = vadd.s32 %v2083_v55, %v2344_v24 }
 0x2f8   :  { %v893_v34 = vpop.permute.xlu0 %892 }
 0x2f9   :  { %v903_v18 = vadd.s32 %v893_v34, %v2344_v24 }
 0x2fb   :  { %vm911_vm6 = vcmp.eq.s32.totalorder %v903_v18, %v830_v51  ;;  %v2359_v51 = vmov 0.0   ;;  %v2361_v18 = vmov 0 }
 0x2fc   :  { %vm2091_vm12 = vmxor %vm911_vm6, %vm1397_vm9  ;;  %v931_v5 = vpop.permute.xlu0 %930 }
 0x300   :  { %v937_v20 = vpop.permute.xlu0 %936 }
 0x301   :  { %vm955_vm2 = vcmp.eq.s32.totalorder %v937_v20, 1 }
 0x305   :  { %v471_v63 = vpop.xlane.xlu1 %470 }
 0x306   :  { %v487_v59 = vsel %vm2348_vm15, 0.0, %v471_v63  ;;  %vm953_vm15 = vcmp.eq.s32.totalorder %v931_v5, 1 }
 0x307   :  { %v495_v1 = vadd.f32 %v487_v59, %v479_v32 }
 0x309   :  { %v703_v53 = vpop.xlane.xlu1 %702  ;;  %v721_v4 = vmul.f32 %v2349_v2, %v495_v1 }
 0x30a   :  { %v724_v29 = vsel %vm2350_vm7, 0.0, %v703_v53 }
 0x30b   :  { %v732_v52 = vadd.f32 %v724_v29, %v716_v8  ;;  %v982_v29 = vsub.f32 %v2054_v17, %v1938_v43 }
 0x30d   :  { %805 = vst.msk [vmem:[#allocation3 + $0x10] sm:$0xff] %vm2323_vm0, %v732_v52  ;;  %v711_v41 = vpop.xlane.xlu1 %710  ;;  %1013 = vperm.xlu0 %1225, %v732_v52  }
 0x30e   :  { %v728_v56 = vsel %vm2351_vm14, 0.0, %v711_v41 }
 0x30f   :  { %v736_v6 = vadd.f32 %v728_v56, %v720_v3  ;;  %v897_v3 = vadd.s32 %v875_v15, %v2344_v24  ;;  %v829_v15 = vadd.s32 40, %v2086_v40  ;;  %v995_v56 = vmul.f32 1.442695, %v982_v29 }
 0x311   :  { %809 = vst.msk [vmem:[#allocation3 + $0x30] sm:$0xff] %vm2323_vm0, %v736_v6  ;;  %v705_v35 = vpop.xlane.xlu1 %704  ;;  %1033 = vperm.xlu0 %1225, %v736_v6   ;;  %vm905_vm1 = vcmp.eq.s32.totalorder %v897_v3, %v2086_v40  ;;  %v943_v40 = vpop.permute.xlu0 %942  ;;  %v977_v3 = vsub.f32 %v1975_v57, %v1923_v42 }
 0x312   :  { %v725_v0 = vsel %vm2352_vm11, 0.0, %v705_v35  ;;  %vm913_vm3 = vmxor %vm905_vm1, %vm1397_vm9 }
 0x313   :  { %v733_v8 = vadd.f32 %v725_v0, %v717_v7  ;;  %vm961_vm14 = vmand %vm953_vm15, %vm913_vm3  ;;  %v985_v5 = vmul.f32 1.442695, %v977_v3 }
 0x314   :  { %vm915_vm11 = vmxor %vm907_vm10, %vm1397_vm9 }
 0x315   :  { %806 = vst.msk [vmem:[#allocation3 + $0x18] sm:$0xff] %vm2323_vm0, %v733_v8  ;;  %v713_v12 = vpop.xlane.xlu1 %712  ;;  %1018 = vperm.xlu1 %1226, %v733_v8   ;;  %948 = vperm.xlu0 %1225, %v927_v47   ;;  %vm2136_vm5 = vmand %vm961_vm14, %vm2356_vm8 }
 0x316   :  { %v729_v14 = vsel %vm2353_vm4, 0.0, %v713_v12  ;;  %v2358_v46 = vsel %vm2136_vm5, 4294967295, %v2357_v46  ;;  %vm963_vm4 = vmand %vm955_vm2, %vm915_vm11  ;;  %v1194_v34 = vsel %vm2136_vm5, 1.0, %v2359_v51 }
 0x317   :  { %v737_v37 = vadd.f32 %v729_v14, %v721_v4  ;;  %vm2360_vm15 = vmmov %vm2356_vm8  ;;  %v987_v4 = vmul.f32 1.442695, %v1987_v45 }
 0x318   :  { %vm2147_vm10 = vmand %vm963_vm4, %vm2360_vm15  ;;  %vm909_vm4 = vcmp.eq.s32.totalorder %v901_v11, %v828_v23 }
 0x319   :  { %810 = vst.msk [vmem:[#allocation3 + $0x38] sm:$0xff] %vm2323_vm0, %v737_v37  ;;  %v878_v33 = vpop.permute.xlu1 %877  ;;  %1038 = vperm.xlu1 %1226, %v737_v37   ;;  %v2362_v18 = vsel %vm2147_vm10, 4294967295, %v2361_v18  ;;  %v1196_v32 = vsel %vm2147_vm10, 1.0, %v2359_v51  ;;  %1319 = vpow2.f32 %v987_v4 }
 0x31a   :  { %v898_v10 = vadd.s32 %v878_v33, %v2344_v24  ;;  %1321 = vpow2.f32 %v995_v56 }
 0x31d   :  { %v884_v49 = vpop.permute.xlu1 %883  ;;  %951 = vperm.xlu1 %1226, %v928_v38  }
 0x31e   :  { %v900_v16 = vadd.s32 %v884_v49, %v2344_v24 }
 0x320   :  { %vm908_vm13 = vcmp.eq.s32.totalorder %v900_v16, %v827_v54  ;;  %v991_v54 = vmul.f32 1.442695, %v1992_v61 }
 0x321   :  { %v890_v26 = vpop.permute.xlu1 %889  ;;  %vm916_vm14 = vmxor %vm908_vm13, %vm1397_vm9 }
 0x322   :  { %v902_v39 = vadd.s32 %v890_v26, %v2344_v24 }
 0x323   :  { %v1320_v6 = vpop.eup %1319 }
 0x324   :  { %vm910_vm3 = vcmp.eq.s32.totalorder %v902_v39, %v829_v15  ;;  %v1322_v43 = vpop.eup %1321 }
 0x325   :  { %v896_v7 = vpop.permute.xlu1 %895 }
 0x326   :  { %v904_v31 = vadd.s32 %v896_v7, %v2344_v24  ;;  %v989_v7 = vmul.f32 1.442695, %v1959_v58 }
 0x328   :  { %vm912_vm6 = vcmp.eq.s32.totalorder %v904_v31, %v831_v13  ;;  %v981_v13 = vsub.f32 %v2077_v48, %v1930_v27  ;;  %v2216_v31 = vsub.f32 %v2081_v19, %v1943_v36  ;;  %v2222_v27 = vsub.f32 %v2062_v9, %v1996_v62 }
 0x329   :  { %v934_v28 = vpop.permute.xlu1 %933  ;;  %vm2124_vm7 = vmxor %vm912_vm6, %vm1397_vm9  ;;  %vm906_vm6 = vcmp.eq.s32.totalorder %v898_v10, %v825_v50 }
 0x32a   :  { %v2355_v30 = vsel %vm2124_vm7, 4294967295, %v2354_v30  ;;  %vm914_vm11 = vmxor %vm906_vm6, %vm1397_vm9  ;;  %vm954_vm0 = vcmp.eq.s32.totalorder %v934_v28, 1  ;;  %v997_v28 = vmul.f32 1.442695, %v2216_v31  ;;  %v999_v36 = vmul.f32 1.442695, %v2222_v27 }
 0x32b   :  { %vm918_vm7 = vmxor %vm910_vm3, %vm1397_vm9 }
 0x32c   :  { %vm917_vm6 = vmxor %vm909_vm4, %vm1397_vm9 }
 0x32d   :  { %v940_v21 = vpop.permute.xlu1 %939  ;;  %vm2365_vm3 = vmmov %vm2360_vm15 }
 0x32e   :  { %vm956_vm1 = vcmp.eq.s32.totalorder %v940_v21, 1 }
 0x32f   :  { %vm964_vm2 = vmand %vm956_vm1, %vm916_vm14  ;;  %vm957_vm14 = vcmp.eq.s32.totalorder %v943_v40, 1 }
 0x330   :  { %vm2162_vm5 = vmand %vm964_vm2, %vm2360_vm15 }
 0x331   :  { %v946_v60 = vpop.permute.xlu1 %945  ;;  %vm962_vm1 = vmand %vm954_vm0, %vm914_vm11  ;;  %v1197_v63 = vsel %vm2162_vm5, 1.0, %v2359_v51 }
 0x332   :  { %vm958_vm8 = vcmp.eq.s32.totalorder %v946_v60, 1  ;;  %vm2368_vm2 = vmmov %vm2365_vm3 }
 0x333   :  { %vm966_vm13 = vmand %vm958_vm8, %vm918_vm7 }
 0x334   :  { %1113 = vadd.xlane.f32.xlu0 %v1194_v34  ;;  %vm2172_vm10 = vmand %vm966_vm13, %vm2365_vm3 }
 0x335   :  { %vm2178_vm15 = vmand %vm962_vm1, %vm2368_vm2  ;;  %v1199_v53 = vsel %vm2172_vm10, 1.0, %v2359_v51  ;;  %vm2378_vm1 = vnez %v2355_v30 }
 0x336   :  { %vm965_vm0 = vmand %vm957_vm14, %vm917_vm6  ;;  %v1195_v2 = vsel %vm2178_vm15, 1.0, %v2359_v51 }
 0x337   :  { %vm2371_vm9 = vmmov %vm2368_vm2 }
 0x338   :  { %1117 = vadd.xlane.f32.xlu0 %v1196_v32  ;;  %vm2193_vm7 = vmand %vm965_vm0, %vm2371_vm9 }
 0x339   :  { %v1198_v41 = vsel %vm2193_vm7, 1.0, %v2359_v51  ;;  %vm2374_vm8 = vmmov %vm2368_vm2 }
 0x33a   :  { %vm2379_vm14 = vmmov %vm2368_vm2  ;;  %vm2382_vm2 = vnez %v2362_v18 }
 0x33c   :  { %1119 = vadd.xlane.f32.xlu0 %v1197_v63 }
 0x340   :  { %1123 = vadd.xlane.f32.xlu0 %v1199_v53 }
 0x341   :  { %1115 = vadd.xlane.f32.xlu1 %v1195_v2 }
 0x343   :  { %v1004_v44 = vpop.permute.xlu0 %1003 }
 0x345   :  { %1121 = vadd.xlane.f32.xlu1 %v1198_v41 }
 0x34b   :  { %v1024_v42 = vpop.permute.xlu0 %1023 }
 0x34f   :  { %v1009_v35 = vpop.permute.xlu1 %1008 }
 0x350   :  { %v1042_v0 = vadd.f32 %v1320_v6, %v1009_v35 }
 0x352   :  { %1323 = vlog2.f32 %v1042_v0 }
 0x353   :  { %v1029_v17 = vpop.permute.xlu1 %1028 }
 0x354   :  { %v1046_v47 = vadd.f32 %v1322_v43, %v1029_v17 }
 0x356   :  { %1325 = vlog2.f32 %v1046_v47 }
 0x357   :  { %1327 = vpow2.f32 %v985_v5 }
 0x35c   :  { %v1324_v8 = vpop.eup %1323 }
 0x35d   :  { %v1052_v12 = vmul.f32 0.6931472, %v1324_v8 }
 0x35f   :  { %v1066_v14 = vsub.f32 %v1987_v45, %v1052_v12  ;;  %v993_v45 = vmul.f32 1.442695, %v981_v13 }
 0x360   :  { %v1326_v37 = vpop.eup %1325 }
 0x361   :  { %v1060_v33 = vmul.f32 0.6931472, %v1326_v37  ;;  %v2203_v38 = vsel %vm2178_vm15, %v1066_v14, 0.0  ;;  %1329 = vpow2.f32 %v993_v45  ;;  %v1328_v25 = vpop.eup %1327 }
 0x362   :  { %1331 = vpow2.f32 %v989_v7  ;;  %v1041_v20 = vadd.f32 %v1328_v25, %v1004_v44 }
 0x363   :  { %v1070_v49 = vsub.f32 %v982_v29, %v1060_v33  ;;  %1333 = vpow2.f32 %v997_v28 }
 0x364   :  { %1335 = vlog2.f32 %v1041_v20 }
 0x365   :  { %v2207_v26 = vsel %vm2172_vm10, %v1070_v49, 0.0  ;;  %1337 = vpow2.f32 %v991_v54 }
 0x36b   :  { %v1330_v57 = vpop.eup %1329 }
 0x36c   :  { %v1045_v48 = vadd.f32 %v1330_v57, %v1024_v42  ;;  %v1332_v19 = vpop.eup %1331 }
 0x36d   :  { %v1334_v50 = vpop.eup %1333 }
 0x36e   :  { %1339 = vlog2.f32 %v1045_v48  ;;  %v1336_v15 = vpop.eup %1335 }
 0x36f   :  { %1341 = vpow2.f32 %v999_v36  ;;  %v1338_v60 = vpop.eup %1337  ;;  %v1050_v62 = vmul.f32 0.6931472, %v1336_v15 }
 0x371   :  { %v1065_v53 = vsub.f32 %v977_v3, %v1050_v62 }
 0x378   :  { %v1340_v23 = vpop.eup %1339 }
 0x379   :  { %v1342_v40 = vpop.eup %1341  ;;  %v1058_v63 = vmul.f32 0.6931472, %v1340_v23 }
 0x37b   :  { %v1069_v56 = vsub.f32 %v981_v13, %v1058_v63 }
 0x38c   :  { %v1014_v16 = vpop.permute.xlu0 %1013 }
 0x38d   :  { %v1043_v21 = vadd.f32 %v1332_v19, %v1014_v16 }
 0x38f   :  { %1343 = vlog2.f32 %v1043_v21 }
 0x390   :  { %v1034_v10 = vpop.permute.xlu0 %1033 }
 0x391   :  { %v1047_v39 = vadd.f32 %v1334_v50, %v1034_v10 }
 0x393   :  { %1345 = vlog2.f32 %v1047_v39 }
 0x394   :  { %v1019_v9 = vpop.permute.xlu1 %1018  ;;  %v949_v34 = vpop.permute.xlu0 %948 }
 0x395   :  { %v1044_v11 = vadd.f32 %v1338_v60, %v1019_v9  ;;  %vm959_vm10 = vcmp.eq.s32.totalorder %v949_v34, 1 }
 0x396   :  { %vm967_vm11 = vmand %vm959_vm10, %vm2091_vm12  ;;  %vm2377_vm12 = vnez %v2358_v46  ;;  %v1077_v46 = vsel %vm2193_vm7, %v1069_v56, 0.0 }
 0x397   :  { %1347 = vlog2.f32 %v1044_v11  ;;  %vm2229_vm4 = vmand %vm967_vm11, %vm2374_vm8  ;;  %v1073_v41 = vsel %vm2377_vm12, %v1065_v53, 0.0 }
 0x398   :  { %v1039_v59 = vpop.permute.xlu1 %1038  ;;  %v1200_v1 = vsel %vm2229_vm4, 1.0, %v2359_v51 }
 0x399   :  { %v1344_v2 = vpop.eup %1343  ;;  %v1048_v4 = vadd.f32 %v1342_v40, %v1039_v59  ;;  %1125 = vadd.xlane.f32.xlu1 %v1200_v1 }
 0x39a   :  { %v1054_v22 = vmul.f32 0.6931472, %v1344_v2 }
 0x39b   :  { %1349 = vlog2.f32 %v1048_v4 }
 0x39c   :  { %v952_v29 = vpop.permute.xlu1 %951  ;;  %v1067_v17 = vsub.f32 %v1959_v58, %v1054_v22 }
 0x39d   :  { %v1346_v6 = vpop.eup %1345  ;;  %vm960_vm13 = vcmp.eq.s32.totalorder %v952_v29, 1  ;;  %1081 = vadd.xlane.f32.xlu1 %v1073_v41 }
 0x39e   :  { %v1062_v35 = vmul.f32 0.6931472, %v1346_v6  ;;  %vm968_vm6 = vmand %vm960_vm13, %vm2378_vm1  ;;  %v1075_v12 = vsel %vm2382_vm2, %v1067_v17, 0.0 }
 0x39f   :  { %vm2242_vm3 = vmand %vm968_vm6, %vm2379_vm14 }
 0x3a0   :  { %v1201_v43 = vsel %vm2242_vm3, 1.0, %v2359_v51  ;;  %v1071_v47 = vsub.f32 %v2216_v31, %v1062_v35 }
 0x3a1   :  { %v1348_v8 = vpop.eup %1347  ;;  %1127 = vadd.xlane.f32.xlu0 %v1201_v43  ;;  %1089 = vadd.xlane.f32.xlu1 %v1077_v46 }
 0x3a2   :  { %v1079_v24 = vsel %vm2229_vm4, %v1071_v47, 0.0  ;;  %v1056_v30 = vmul.f32 0.6931472, %v1348_v8 }
 0x3a4   :  { %v1068_v52 = vsub.f32 %v1992_v61, %v1056_v30 }
 0x3a5   :  { %v1350_v14 = vpop.eup %1349  ;;  %1083 = vadd.xlane.f32.xlu0 %v2203_v38  ;;  %1085 = vadd.xlane.f32.xlu1 %v1075_v12 }
 0x3a6   :  { %v1064_v51 = vmul.f32 0.6931472, %v1350_v14  ;;  %v1076_v33 = vsel %vm2162_vm5, %v1068_v52, 0.0  ;;  %vm2383_vm5 = vcmask 7168  }
 0x3a7   :  { %vm2384_vm15 = vmmov %vm2383_vm5 }
 0x3a8   :  { %v1072_v58 = vsub.f32 %v2222_v27, %v1064_v51  ;;  %vm2385_vm0 = vmmov %vm2383_vm5 }
 0x3a9   :  { %1091 = vadd.xlane.f32.xlu0 %v2207_v26  ;;  %1093 = vadd.xlane.f32.xlu1 %v1079_v24  ;;  %vm2386_vm9 = vmmov %vm2385_vm0 }
 0x3aa   :  { %v1080_v37 = vsel %vm2242_vm3, %v1072_v58, 0.0  ;;  %vm2387_vm7 = vmmov %vm2385_vm0 }
 0x3ab   :  { %vm2388_vm10 = vmmov %vm2385_vm0 }
 0x3ac   :  { %vm2389_vm11 = vmmov %vm2385_vm0 }
 0x3ad   :  { %1087 = vadd.xlane.f32.xlu0 %v1076_v33  ;;  %vm2390_vm8 = vmmov %vm2385_vm0 }
 0x3b1   :  { %1095 = vadd.xlane.f32.xlu0 %v1080_v37 }
 0x3c1   :  { %v1114_v18 = vpop.xlane.xlu0 %1113 }
 0x3c2   :  { %v1137_v3 = vadd.f32 1e-05, %v1114_v18 }
 0x3c4   :  { %1351 = vrcp.f32 %v1137_v3 }
 0x3c5   :  { %v1118_v38 = vpop.xlane.xlu0 %1117 }
 0x3c6   :  { %v1139_v45 = vadd.f32 1e-05, %v1118_v38 }
 0x3c9   :  { %v1120_v13 = vpop.xlane.xlu0 %1119 }
 0x3ca   :  { %v1140_v57 = vadd.f32 1e-05, %v1120_v13 }
 0x3cd   :  { %v1124_v7 = vpop.xlane.xlu0 %1123 }
 0x3ce   :  { %v1116_v49 = vpop.xlane.xlu1 %1115  ;;  %v1142_v44 = vadd.f32 1e-05, %v1124_v7  ;;  %v1352_v20 = vpop.eup %1351 }
 0x3cf   :  { %v1138_v26 = vadd.f32 1e-05, %v1116_v49 }
 0x3d2   :  { %v1122_v5 = vpop.xlane.xlu1 %1121 }
 0x3d3   :  { %v1141_v61 = vadd.f32 1e-05, %v1122_v5 }
 0x3d5   :  { %1353 = vrcp.f32 %v1141_v61 }
 0x3d6   :  { %1355 = vrcp.f32 %v1139_v45 }
 0x3d7   :  { %1357 = vrcp.f32 %v1138_v26 }
 0x3d8   :  { %1359 = vrcp.f32 %v1142_v44 }
 0x3df   :  { %v1354_v36 = vpop.eup %1353 }
 0x3e0   :  { %v1356_v10 = vpop.eup %1355 }
 0x3e1   :  { %v1358_v60 = vpop.eup %1357 }
 0x3e2   :  { %v1360_v11 = vpop.eup %1359 }
 0x426   :  { %v1126_v31 = vpop.xlane.xlu1 %1125 }
 0x427   :  { %v1143_v55 = vadd.f32 1e-05, %v1126_v31 }
 0x429   :  { %1361 = vrcp.f32 %v1143_v55 }
 0x42a   :  { %v1082_v25 = vpop.xlane.xlu1 %1081  ;;  %1363 = vrcp.f32 %v1140_v57 }
 0x42b   :  { %v1129_v28 = vmul.f32 -1.0, %v1082_v25 }
 0x42d   :  { %v1146_v42 = vmul.f32 %v1352_v20, %v1129_v28 }
 0x42e   :  { %v1090_v54 = vpop.xlane.xlu1 %1089  ;;  %v1128_v27 = vpop.xlane.xlu0 %1127 }
 0x42f   :  { %1161 = vst.msk [vmem:[%s2300_s3] sm:$0xff] %vm2383_vm5, %v1146_v42  ;;  %v1133_v48 = vmul.f32 -1.0, %v1090_v54  ;;  %v1144_v16 = vadd.f32 1e-05, %v1128_v27 }
 0x431   :  { %v1154_v19 = vmul.f32 %v1354_v36, %v1133_v48  ;;  %1365 = vrcp.f32 %v1144_v16 }
 0x432   :  { %v1086_v21 = vpop.xlane.xlu1 %1085  ;;  %v1084_v50 = vpop.xlane.xlu0 %1083 }
 0x433   :  { %1165 = vst.msk [vmem:[%s2300_s3 + $0x20] sm:$0xff] %vm2384_vm15, %v1154_v19  ;;  %v1131_v15 = vmul.f32 -1.0, %v1086_v21  ;;  %v1130_v39 = vmul.f32 -1.0, %v1084_v50  ;;  %v1362_v63 = vpop.eup %1361 }
 0x434   :  { %v1364_v4 = vpop.eup %1363 }
 0x435   :  { %v1150_v62 = vmul.f32 %v1356_v10, %v1131_v15  ;;  %v1148_v9 = vmul.f32 %v1358_v60, %v1130_v39 }
 0x436   :  { %v1094_v34 = vpop.xlane.xlu1 %1093  ;;  %v1092_v23 = vpop.xlane.xlu0 %1091 }
 0x437   :  { %1163 = vst.msk [vmem:[%s2300_s3 + $0x10] sm:$0xff] %vm2385_vm0, %v1150_v62  ;;  %v1135_v32 = vmul.f32 -1.0, %v1094_v34  ;;  %v1134_v40 = vmul.f32 -1.0, %v1092_v23 }
 0x438   :  { %1162 = vst.msk [vmem:[%s2300_s3 + $0x8] sm:$0xff] %vm2386_vm9, %v1148_v9 }
 0x439   :  { %v1158_v59 = vmul.f32 %v1362_v63, %v1135_v32  ;;  %v1156_v1 = vmul.f32 %v1360_v11, %v1134_v40 }
 0x43a   :  { %v1088_v53 = vpop.xlane.xlu0 %1087 }
 0x43b   :  { %1167 = vst.msk [vmem:[%s2300_s3 + $0x30] sm:$0xff] %vm2387_vm7, %v1158_v59  ;;  %v1132_v2 = vmul.f32 -1.0, %v1088_v53  ;;  %v1366_v56 = vpop.eup %1365 }
 0x43c   :  { %1166 = vst.msk [vmem:[%s2300_s3 + $0x28] sm:$0xff] %vm2388_vm10, %v1156_v1 }
 0x43d   :  { %v1152_v22 = vmul.f32 %v1364_v4, %v1132_v2 }
 0x43e   :  { %v1096_v29 = vpop.xlane.xlu0 %1095 }
 0x43f   :  { %1164 = vst.msk [vmem:[%s2300_s3 + $0x18] sm:$0xff] %vm2389_vm11, %v1152_v22  ;;  %v1136_v41 = vmul.f32 -1.0, %v1096_v29 }
 0x441   :  { %v1160_v6 = vmul.f32 %v1366_v56, %v1136_v41 }
 0x443   :  { %1168 = vst.msk [vmem:[%s2300_s3 + $0x38] sm:$0xff] %vm2390_vm8, %v1160_v6 }
 0x444   :  { %1173 = vsyncpa [#allocation6], 1 }

</bundles_post_ra>
